<compile_context>
chip_gen: v7x
topology: tpu7x:2x2x1
jax: 0.10.0
libtpu: 0.0.40
codegen_flags: <defaults>
</compile_context>

<pallas_src>
import jax
import jax.numpy as jnp
from jax.experimental import pallas as pl
from jax.experimental.pallas import tpu as pltpu


def pack_head_weights(wk, wq, wv):
    """Pack [Wk | Wq * H^-0.5 | Wv] into one (C, 3H) bf16 operand.

    Call ONCE at parameter init / checkpoint load and cache the result; doing
    it per forward call would add an un-hidden XLA concat+convert pass over
    the weights on every step.
    """
    head_size = wq.shape[-1]
    scale = head_size ** -0.5
    return jnp.concatenate([wk, wq * scale, wv], axis=-1).astype(jnp.bfloat16)


def _head_kernel(x_ref, w_ref, o_ref):
    # x_ref: (bb, T, C) f32/bf16, w_ref: (C, 3H) bf16 packed [Wk|Wq*s|Wv],
    # o_ref: (bb, T, H)
    bb, T, C = x_ref.shape
    H = w_ref.shape[-1] // 3

    x = x_ref[...].astype(jnp.bfloat16)   # cast once; no-op if x already bf16
    w = w_ref[...]                        # already bf16

    # Fused QKV projection over the whole batch block: one wide-M MXU matmul
    # (M = bb*T), f32 accumulation.  The 1/sqrt(H) scale is pre-folded into
    # the Wq columns, so no post-matmul scaling is needed.
    kqv = jnp.dot(x.reshape(bb * T, C), w,
                  preferred_element_type=jnp.float32)           # (bb*T, 3H)
    kqv = kqv.reshape(bb, T, 3 * H)
    k = kqv[..., :H]                                            # (bb, T, H)
    q = kqv[..., H:2 * H]                                       # pre-scaled
    v = kqv[..., 2 * H:]

    # Attention scores: contract the head axis of both operands (no k
    # transpose through the XLU), batched over the batch block.
    wei = jax.lax.dot_general(
        q.astype(jnp.bfloat16), k.astype(jnp.bfloat16),
        dimension_numbers=(((2,), (2,)), ((0,), (0,))),
        preferred_element_type=jnp.float32)                     # (bb, T, T)

    # Causal mask: allow col <= row (tril), else -inf.  Safe because the
    # diagonal is always unmasked (no all-masked softmax rows).
    row = jax.lax.broadcasted_iota(jnp.int32, (bb, T, T), 1)
    col = jax.lax.broadcasted_iota(jnp.int32, (bb, T, T), 2)
    wei = jnp.where(col <= row, wei, -jnp.inf)

    # Numerically stable softmax along the last dim, kept in f32.
    wei = wei - jnp.max(wei, axis=-1, keepdims=True)
    wei = jnp.exp(wei)
    wei = wei * pl.reciprocal(jnp.sum(wei, axis=-1, keepdims=True), approx=True)

    # dropout on wei: identity (eval mode).

    out = jax.lax.dot_general(
        wei.astype(jnp.bfloat16), v.astype(jnp.bfloat16),
        dimension_numbers=(((2,), (1,)), ((0,), (0,))),
        preferred_element_type=jnp.float32)                     # (bb, T, H)
    o_ref[...] = out.astype(o_ref.dtype)


def head_forward(x, w_packed, *, batch_block=None):
    """x: (B, T, C); w_packed: (C, 3H) bf16 from pack_head_weights -> (B, T, H).

    batch_block: batch rows per grid step.  Default = B (single grid step;
    best on single-TC v5e/v6e).  On v7x (2 TensorCores) pass B // 2 so the
    "parallel" grid axis keeps both cores busy.
    """
    B, T, C = x.shape
    H = w_packed.shape[-1] // 3
    bb = B if batch_block is None else batch_block
    assert B % bb == 0

    return pl.pallas_call(
        _head_kernel,
        out_shape=jax.ShapeDtypeStruct((B, T, H), x.dtype),
        grid_spec=pltpu.PrefetchScalarGridSpec(
            num_scalar_prefetch=0,
            grid=(B // bb,),
            in_specs=[
                pl.BlockSpec((bb, T, C), lambda i: (i, 0, 0)),
                pl.BlockSpec((C, 3 * H), lambda i: (0, 0)),
            ],
            out_specs=pl.BlockSpec((bb, T, H), lambda i: (i, 0, 0)),
        ),
        compiler_params=pltpu.CompilerParams(
            dimension_semantics=("parallel",),
        ),
    )(x, w_packed)


if __name__ == "__main__":
    # Module-consistent shapes: C = n_embd = 256, head_size = 32,
    # T = 128 <= block_size = 192, B = 2.
    B, T, C, Hd = 2, 128, 256, 32

    key = jax.random.PRNGKey(0)
    kx, kk, kq, kv = jax.random.split(key, 4)

    x = jax.random.normal(kx, (B, T, C), dtype=jnp.float32)
    bound = C ** -0.5  # PyTorch nn.Linear default init range
    wk = jax.random.uniform(kk, (C, Hd), jnp.float32, -bound, bound)
    wq = jax.random.uniform(kq, (C, Hd), jnp.float32, -bound, bound)
    wv = jax.random.uniform(kv, (C, Hd), jnp.float32, -bound, bound)

    # Parameter preparation: pack once, reuse for every forward call.
    w_packed = jax.block_until_ready(pack_head_weights(wk, wq, wv))

    out = jax.block_until_ready(head_forward(x, w_packed))
    assert out.shape == (B, T, Hd)

    # Reference: f32 math on the same bf16-quantized operands the kernel feeds
    # to the MXU (remaining diffs are intermediate bf16 roundings, accumulation
    # order, and the approx reciprocal).
    xb = x.astype(jnp.bfloat16).astype(jnp.float32)
    wb = w_packed.astype(jnp.float32)
    kqv = xb @ wb
    k_, q_, v_ = kqv[..., :Hd], kqv[..., Hd:2 * Hd], kqv[..., 2 * Hd:]
    wei = q_ @ jnp.swapaxes(k_, -2, -1)  # scale already folded into q_
    mask = jnp.tril(jnp.ones((T, T), dtype=bool))
    wei = jnp.where(mask, wei, -jnp.inf)
    wei = jax.nn.softmax(wei, axis=-1)
    ref = wei @ v_

    max_err = float(jnp.max(jnp.abs(out - ref)))
    assert jnp.allclose(out, ref, atol=2e-2, rtol=2e-2), max_err

    print("KERNEL_OK")
</pallas_src>

<mosaic_0001>
module attributes {stable_mosaic.version = 11 : i64} {
  func.func @_head_kernel(%arg0: i32, %arg1: memref<2x128x256xf32, #tpu.memory_space<vmem>>, %arg2: memref<256x96xbf16, #tpu.memory_space<vmem>>, %arg3: memref<2x128x32xf32, #tpu.memory_space<vmem>>) attributes {dimension_semantics = [#tpu.dimension_semantics<parallel>], iteration_bounds = array<i64: 1>, scalar_prefetch = 0 : i64, scratch_operands = 0 : i64, tpu.core_type = #tpu.core_type<tc>, window_params = [{transform_indices = @transform_0, window_bounds = array<i64: 2, 128, 256>}, {pipeline_mode = #tpu.pipeline_mode<synchronous>, transform_indices = @transform_1, window_bounds = array<i64: 256, 96>}, {transform_indices = @transform_2, window_bounds = array<i64: 2, 128, 32>}]} {
    %c0 = arith.constant 0 : index
    %c0_0 = arith.constant 0 : index
    %c0_1 = arith.constant 0 : index
    %0 = vector.load %arg1[%c0, %c0_0, %c0_1] : memref<2x128x256xf32, #tpu.memory_space<vmem>>, vector<2x128x256xf32>
    %1 = arith.truncf %0 : vector<2x128x256xf32> to vector<2x128x256xbf16>
    %c0_2 = arith.constant 0 : index
    %c0_3 = arith.constant 0 : index
    %2 = vector.load %arg2[%c0_2, %c0_3] : memref<256x96xbf16, #tpu.memory_space<vmem>>, vector<256x96xbf16>
    %3 = vector.shape_cast %1 : vector<2x128x256xbf16> to vector<256x256xbf16>
    %cst = arith.constant dense<0.000000e+00> : vector<256x96xf32>
    %4 = tpu.matmul %3, %2, %cst {dimension_numbers = #tpu.dot_dimension_numbers<[1], [0], [0], [1], [0, 0, 1, 1], [], []>} : vector<256x256xbf16>, vector<256x96xbf16>, vector<256x96xf32> -> vector<256x96xf32>
    %5 = vector.shape_cast %4 : vector<256x96xf32> to vector<2x128x96xf32>
    %6 = vector.extract_strided_slice %5 {offsets = [0, 0, 0], sizes = [2, 128, 32], strides = [1, 1, 1]} : vector<2x128x96xf32> to vector<2x128x32xf32>
    %7 = vector.extract_strided_slice %5 {offsets = [0, 0, 32], sizes = [2, 128, 32], strides = [1, 1, 1]} : vector<2x128x96xf32> to vector<2x128x32xf32>
    %8 = vector.extract_strided_slice %5 {offsets = [0, 0, 64], sizes = [2, 128, 32], strides = [1, 1, 1]} : vector<2x128x96xf32> to vector<2x128x32xf32>
    %9 = arith.truncf %7 : vector<2x128x32xf32> to vector<2x128x32xbf16>
    %10 = arith.truncf %6 : vector<2x128x32xf32> to vector<2x128x32xbf16>
    %cst_4 = arith.constant dense<0.000000e+00> : vector<2x128x128xf32>
    %11 = tpu.matmul %9, %10, %cst_4 {dimension_numbers = #tpu.dot_dimension_numbers<[2], [2], [1], [1], [0, 0, 0, 1, 1, 1], [0], [0]>} : vector<2x128x32xbf16>, vector<2x128x32xbf16>, vector<2x128x128xf32> -> vector<2x128x128xf32>
    %12 = tpu.iota {dimensions = array<i32: 1>} : vector<2x128x128xi32>
    %13 = tpu.iota {dimensions = array<i32: 2>} : vector<2x128x128xi32>
    %14 = arith.cmpi sle, %13, %12 : vector<2x128x128xi32>
    %cst_5 = arith.constant 0xFF800000 : f32
    %15 = vector.broadcast %cst_5 : f32 to vector<2x128x128xf32>
    %16 = arith.select %14, %11, %15 : vector<2x128x128xi1>, vector<2x128x128xf32>
    %cst_6 = arith.constant dense<0xFF800000> : vector<2x128xf32>
    %17 = vector.multi_reduction <maximumf>, %16, %cst_6 [2] : vector<2x128x128xf32> to vector<2x128xf32>
    %18 = vector.shape_cast %17 : vector<2x128xf32> to vector<2x128x1xf32>
    %19 = vector.broadcast %18 : vector<2x128x1xf32> to vector<2x128x128xf32>
    %20 = arith.subf %16, %19 : vector<2x128x128xf32>
    %21 = math.exp %20 : vector<2x128x128xf32>
    %cst_7 = arith.constant dense<0.000000e+00> : vector<2x128xf32>
    %22 = vector.multi_reduction <add>, %21, %cst_7 [2] : vector<2x128x128xf32> to vector<2x128xf32>
    %23 = vector.shape_cast %22 : vector<2x128xf32> to vector<2x128x1xf32>
    %24 = tpu.reciprocal %23 {approx = true} : vector<2x128x1xf32> -> vector<2x128x1xf32>
    %25 = vector.broadcast %24 : vector<2x128x1xf32> to vector<2x128x128xf32>
    %26 = arith.mulf %21, %25 : vector<2x128x128xf32>
    %27 = arith.truncf %26 : vector<2x128x128xf32> to vector<2x128x128xbf16>
    %28 = arith.truncf %8 : vector<2x128x32xf32> to vector<2x128x32xbf16>
    %cst_8 = arith.constant dense<0.000000e+00> : vector<2x128x32xf32>
    %29 = tpu.matmul %27, %28, %cst_8 {dimension_numbers = #tpu.dot_dimension_numbers<[2], [1], [1], [2], [0, 0, 0, 1, 1, 2], [0], [0]>} : vector<2x128x128xbf16>, vector<2x128x32xbf16>, vector<2x128x32xf32> -> vector<2x128x32xf32>
    %c0_9 = arith.constant 0 : index
    %c0_10 = arith.constant 0 : index
    %c0_11 = arith.constant 0 : index
    %30 = vector.load %arg3[%c0_9, %c0_10, %c0_11] : memref<2x128x32xf32, #tpu.memory_space<vmem>>, vector<2x128x32xf32>
    tpu.vector_store %arg3[%c0_9, %c0_10, %c0_11], %29 {strides = array<i32>} : memref<2x128x32xf32, #tpu.memory_space<vmem>>, vector<2x128x32xf32>,
    return
  }
  func.func @transform_0(%arg0: i32) -> (i32, i32, i32) {
    %c0_i32 = arith.constant 0 : i32
    %c0_i32_0 = arith.constant 0 : i32
    %c0_i32_1 = arith.constant 0 : i32
    return %arg0, %c0_i32, %c0_i32_0 : i32, i32, i32
  }
  func.func @transform_1(%arg0: i32) -> (i32, i32) {
    %c0_i32 = arith.constant 0 : i32
    %c0_i32_0 = arith.constant 0 : i32
    %c0_i32_1 = arith.constant 0 : i32
    return %c0_i32, %c0_i32_0 : i32, i32
  }
  func.func @transform_2(%arg0: i32) -> (i32, i32, i32) {
    %c0_i32 = arith.constant 0 : i32
    %c0_i32_0 = arith.constant 0 : i32
    %c0_i32_1 = arith.constant 0 : i32
    return %arg0, %c0_i32, %c0_i32_0 : i32, i32, i32
  }
}

</mosaic_0001>

<bundles_post_ra>
// kernel: tpu_custom_call.1
= control target key start
LH: loop header
LB: loop body
LE: loop exit
PB: predicated region body
PF: predicated region fallthrough
CT: control target
= control target key end

     0   :  { %7 = vsyncpa [#allocation3], 0  ;;  %s1941_s9 = smov [#allocation2]   ;;  %s2776_s0 = inlined_call_operand.hbm [shape: f32[2,128,256], index: 0, kind: input, shape index: {}]   ;;  %s2777_s1 = inlined_call_operand.vmem [shape: bf16[256,96], index: 1, kind: input, shape index: {}]   ;;  %s2778_s2 = inlined_call_operand.vmem [shape: f32[2,128,32], index: 2, kind: output, shape index: {}]  }
   0x1   :  { %s13_s10 = sshll.u32 %s1941_s9, 4  ;;  %s1917_s13 = scalar_lea.hbm %s2776_s0, 8192  ;;  %s14_s10 = int_to_ptr.vmem [resolvable:$true] %s13_s10 }
   0x2   :  { %p1918_p0 = scmp.ne.s32.totalorder %s2776_s0, %s1917_s13  ;;  %p1921_p1 = scmp.lt.u32.totalorder %s1917_s13, %s2776_s0 }
   0x4   :  { %p1923_p2 = pnand %p1921_p1, %p1918_p0 }
   0x6   :  { %1926 = shalt.err (!%p1923_p2)
}
   0x7   :  { %s1927_s18 = scalar_lea.vmem %s14_s10, 8192  ;;  %p1932_p4 = scmp.lt.s32.totalorder %s14_s10, %s14_s10 }
   0x8   :  { %p1928_p3 = scmp.ne.s32.totalorder %s14_s10, %s1927_s18  ;;  %p1933_p5 = scmp.lt.s32.totalorder %s1927_s18, %s1927_s18 }
   0xa   :  { %p1934_p6 = por %p1933_p5, %p1932_p4 }
   0xc   :  { %p1935_p7 = pnand %p1934_p6, %p1928_p3 }
   0xe   :  { %1938 = shalt.err (!%p1935_p7)
}
   0xf   :  { %s1942_s19 = smov 256   ;;  %s1943_s20 = smov 16  }
  0x10   :  { %19 = dma.hbm_to_vmem [thread:$0]  %s2776_s0, 8192, %s14_s10, [#allocation3], %s1942_s19, %s1942_s19, %s1943_s20  }
  0x11   :  { %1939 = dma.done.wait [#allocation3], 8192  }
  0x12   :  { %1940 = vsyncadd [#allocation3], 4294959104  ;;  %v1773_v0 = vld [vmem:[%s2777_s1 + $0x40] sm:$0xff]   ;;  %v1775_v2 = vld [vmem:[%s2777_s1 + $0x48] sm:$0xff]   ;;  %vm2779_vm0 = vcmask 261120   ;;  %s1945_s26 = smov 64  }
  0x13   :  { %v1774_v1 = vld [vmem:[%s2777_s1] sm:$0xff]   ;;  %1448 = vmatprep.subr.bf16.mxu0 %v1773_v0  ;;  %v1776_v3 = vld [vmem:[%s2777_s1 + $0x8] sm:$0xff]   ;;  %v1777_v4 = vld [vmem:[%s2777_s1 + $0x50] sm:$0xff]  }
  0x14   :  { %1449 = vmatpush3.bf16.msra.mxu0 %v1774_v1  ;;  %v1778_v5 = vld [vmem:[%s2777_s1 + $0x10] sm:$0xff]   ;;  %v1779_v6 = vld [vmem:[%s2777_s1 + $0x58] sm:$0xff]   ;;  %v1781_v8 = vld [vmem:[%s2777_s1 + $0x60] sm:$0xff]  }
  0x15   :  { %1450 = vmatprep.subr.bf16.mxu0 %v1775_v2  ;;  %v1780_v7 = vld [vmem:[%s2777_s1 + $0x18] sm:$0xff]   ;;  %v1782_v9 = vld [vmem:[%s2777_s1 + $0x20] sm:$0xff]   ;;  %v1783_v10 = vld [vmem:[%s2777_s1 + $0x68] sm:$0xff]  }
  0x16   :  { %v27_v11 = vld [vmem:[#allocation2 + $0x8] sm:$0xff]  ;;  %v29_v12 = vld [vmem:[#allocation2 + $0x18] sm:$0xff]  ;;  %v1785_v15 = vld [vmem:[%s2777_s1 + $0x70] sm:$0xff]  }
  0x17   :  { %v91_v13 = vpack.c.bf16 %v29_v12, %v27_v11  ;;  %v1784_v14 = vld [vmem:[%s2777_s1 + $0x28] sm:$0xff]   ;;  %v1786_v16 = vld [vmem:[%s2777_s1 + $0x30] sm:$0xff]   ;;  %v1787_v17 = vld [vmem:[%s2777_s1 + $0x78] sm:$0xff]  }
  0x18   :  { %1451 = vmatpush3.bf16.msra.mxu0 %v1776_v3  ;;  %v1788_v18 = vld [vmem:[%s2777_s1 + $0x38] sm:$0xff]   ;;  %v26_v19 = vld [vmem:[#allocation2] sm:$0xff]  ;;  %v28_v20 = vld [vmem:[#allocation2 + $0x10] sm:$0xff]  ;;  %s1944_s1 = smov 96  }
  0x19   :  { %1452 = vmatprep.subr.bf16.mxu0 %v1777_v4  ;;  %282 = vmatprep.mubr.bf16.mxu0 %v91_v13  ;;  %v31_v21 = vld [vmem:[#allocation2 + $0x28] sm:$0xff]  ;;  %v33_v22 = vld [vmem:[#allocation2 + $0x38] sm:$0xff]  ;;  %v90_v23 = vpack.c.bf16 %v28_v20, %v26_v19  ;;  %v30_v25 = vld [vmem:[#allocation2 + $0x20] sm:$0xff] }
  0x1a   :  { %v93_v24 = vpack.c.bf16 %v33_v22, %v31_v21  ;;  %v32_v26 = vld [vmem:[#allocation2 + $0x30] sm:$0xff]  ;;  %v35_v27 = vld [vmem:[#allocation2 + $0x48] sm:$0xff]  ;;  %v37_v28 = vld [vmem:[#allocation2 + $0x58] sm:$0xff] }
  0x1b   :  { %v92_v29 = vpack.c.bf16 %v32_v26, %v30_v25  ;;  %v95_v30 = vpack.c.bf16 %v37_v28, %v35_v27  ;;  %v34_v31 = vld [vmem:[#allocation2 + $0x40] sm:$0xff]  ;;  %v36_v32 = vld [vmem:[#allocation2 + $0x50] sm:$0xff]  ;;  %v39_v33 = vld [vmem:[#allocation2 + $0x68] sm:$0xff] }
  0x1c   :  { %1453 = vmatpush3.bf16.msra.mxu0 %v1778_v5  ;;  %v41_v34 = vld [vmem:[#allocation2 + $0x78] sm:$0xff]  ;;  %v94_v35 = vpack.c.bf16 %v36_v32, %v34_v31  ;;  %v38_v37 = vld [vmem:[#allocation2 + $0x60] sm:$0xff]  ;;  %v40_v38 = vld [vmem:[#allocation2 + $0x70] sm:$0xff] }
  0x1d   :  { %1454 = vmatprep.subr.bf16.mxu0 %v1779_v6  ;;  %v97_v36 = vpack.c.bf16 %v41_v34, %v39_v33  ;;  %v43_v39 = vld [vmem:[#allocation2 + $0x88] sm:$0xff]  ;;  %v45_v40 = vld [vmem:[#allocation2 + $0x98] sm:$0xff]  ;;  %v96_v41 = vpack.c.bf16 %v40_v38, %v38_v37  ;;  %v42_v43 = vld [vmem:[#allocation2 + $0x80] sm:$0xff] }
  0x1e   :  { %v99_v42 = vpack.c.bf16 %v45_v40, %v43_v39  ;;  %v44_v44 = vld [vmem:[#allocation2 + $0x90] sm:$0xff]  ;;  %v47_v45 = vld [vmem:[#allocation2 + $0xa8] sm:$0xff]  ;;  %v49_v46 = vld [vmem:[#allocation2 + $0xb8] sm:$0xff] }
  0x1f   :  { %v98_v47 = vpack.c.bf16 %v44_v44, %v42_v43  ;;  %v101_v48 = vpack.c.bf16 %v49_v46, %v47_v45  ;;  %v46_v49 = vld [vmem:[#allocation2 + $0xa0] sm:$0xff]  ;;  %v48_v50 = vld [vmem:[#allocation2 + $0xb0] sm:$0xff]  ;;  %v51_v51 = vld [vmem:[#allocation2 + $0xc8] sm:$0xff] }
  0x20   :  { %1455 = vmatpush3.bf16.msra.mxu0 %v1780_v7  ;;  %v53_v52 = vld [vmem:[#allocation2 + $0xd8] sm:$0xff]  ;;  %v100_v53 = vpack.c.bf16 %v48_v50, %v46_v49  ;;  %v50_v55 = vld [vmem:[#allocation2 + $0xc0] sm:$0xff]  ;;  %v52_v56 = vld [vmem:[#allocation2 + $0xd0] sm:$0xff] }
  0x21   :  { %1456 = vmatprep.subr.bf16.mxu0 %v1781_v8  ;;  %v103_v54 = vpack.c.bf16 %v53_v52, %v51_v51  ;;  %v55_v57 = vld [vmem:[#allocation2 + $0xe8] sm:$0xff]  ;;  %v57_v58 = vld [vmem:[#allocation2 + $0xf8] sm:$0xff]  ;;  %v102_v59 = vpack.c.bf16 %v52_v56, %v50_v55  ;;  %v54_v61 = vld [vmem:[#allocation2 + $0xe0] sm:$0xff] }
  0x22   :  { %v105_v60 = vpack.c.bf16 %v57_v58, %v55_v57  ;;  %v56_v62 = vld [vmem:[#allocation2 + $0xf0] sm:$0xff]  ;;  %v59_v63 = vld [vmem:[#allocation2 + $0x108] sm:$0xff]  ;;  %v61_v0 = vld [vmem:[#allocation2 + $0x118] sm:$0xff] }
  0x23   :  { %v104_v1 = vpack.c.bf16 %v56_v62, %v54_v61  ;;  %v107_v2 = vpack.c.bf16 %v61_v0, %v59_v63  ;;  %v58_v3 = vld [vmem:[#allocation2 + $0x100] sm:$0xff]  ;;  %v60_v4 = vld [vmem:[#allocation2 + $0x110] sm:$0xff]  ;;  %v63_v5 = vld [vmem:[#allocation2 + $0x128] sm:$0xff] }
  0x24   :  { %1457 = vmatpush3.bf16.msra.mxu0 %v1782_v9  ;;  %v65_v6 = vld [vmem:[#allocation2 + $0x138] sm:$0xff]  ;;  %v106_v7 = vpack.c.bf16 %v60_v4, %v58_v3  ;;  %v62_v9 = vld [vmem:[#allocation2 + $0x120] sm:$0xff]  ;;  %v67_v11 = vld [vmem:[#allocation2 + $0x148] sm:$0xff] }
  0x25   :  { %1458 = vmatprep.subr.bf16.mxu0 %v1783_v10  ;;  %v109_v8 = vpack.c.bf16 %v65_v6, %v63_v5  ;;  %v64_v10 = vld [vmem:[#allocation2 + $0x130] sm:$0xff]  ;;  %v69_v12 = vld [vmem:[#allocation2 + $0x158] sm:$0xff]  ;;  %v70_v21 = vld [vmem:[#allocation2 + $0x160] sm:$0xff] }
  0x26   :  { %v108_v13 = vpack.c.bf16 %v64_v10, %v62_v9  ;;  %v72_v22 = vld [vmem:[#allocation2 + $0x170] sm:$0xff]  ;;  %v74_v27 = vld [vmem:[#allocation2 + $0x180] sm:$0xff] }
  0x27   :  { %v112_v25 = vpack.c.bf16 %v72_v22, %v70_v21  ;;  %v76_v28 = vld [vmem:[#allocation2 + $0x190] sm:$0xff]  ;;  %v78_v33 = vld [vmem:[#allocation2 + $0x1a0] sm:$0xff] }
  0x28   :  { %1459 = vmatpush3.bf16.msra.mxu0 %v1784_v14  ;;  %v111_v14 = vpack.c.bf16 %v69_v12, %v67_v11  ;;  %v114_v31 = vpack.c.bf16 %v76_v28, %v74_v27  ;;  %v80_v34 = vld [vmem:[#allocation2 + $0x1b0] sm:$0xff]  ;;  %v82_v39 = vld [vmem:[#allocation2 + $0x1c0] sm:$0xff] }
  0x29   :  { %1460 = vmatprep.subr.bf16.mxu0 %v1785_v15  ;;  %v66_v15 = vld [vmem:[#allocation2 + $0x140] sm:$0xff]  ;;  %v116_v37 = vpack.c.bf16 %v80_v34, %v78_v33  ;;  %v84_v40 = vld [vmem:[#allocation2 + $0x1d0] sm:$0xff] }
  0x2a   :  { %v118_v43 = vpack.c.bf16 %v84_v40, %v82_v39  ;;  %v86_v45 = vld [vmem:[#allocation2 + $0x1e0] sm:$0xff]  ;;  %v88_v46 = vld [vmem:[#allocation2 + $0x1f0] sm:$0xff] }
  0x2c   :  { %1461 = vmatpush3.bf16.msra.mxu0 %v1786_v16  ;;  %v68_v16 = vld [vmem:[#allocation2 + $0x150] sm:$0xff] }
  0x2d   :  { %1462 = vmatprep.subr.bf16.mxu0 %v1787_v17  ;;  %v71_v17 = vld [vmem:[#allocation2 + $0x168] sm:$0xff]  ;;  %v110_v19 = vpack.c.bf16 %v68_v16, %v66_v15 }
  0x30   :  { %1463 = vmatpush3.bf16.msra.mxu0 %v1788_v18  ;;  %v73_v18 = vld [vmem:[#allocation2 + $0x178] sm:$0xff] }
  0x31   :  { %v113_v20 = vpack.c.bf16 %v73_v18, %v71_v17 }
  0x33   :  { %283 = vmatmul.mubr.bf16.vlgmr.msra.gmra.mrb[0].mxu0 %v90_v23  ;;  %v75_v23 = vld [vmem:[#allocation2 + $0x188] sm:$0xff] }
  0x34   :  { %290 = vmatprep.mubr.bf16.mxu0 %v93_v24  ;;  %v77_v24 = vld [vmem:[#allocation2 + $0x198] sm:$0xff] }
  0x35   :  { %v115_v26 = vpack.c.bf16 %v77_v24, %v75_v23 }
  0x3b   :  { %291 = vmatmul.mubr.bf16.gmra.mrb[4].mxu0 %v92_v29  ;;  %v79_v29 = vld [vmem:[#allocation2 + $0x1a8] sm:$0xff] }
  0x3c   :  { %298 = vmatprep.mubr.bf16.mxu0 %v95_v30  ;;  %v81_v30 = vld [vmem:[#allocation2 + $0x1b8] sm:$0xff] }
  0x3d   :  { %v117_v32 = vpack.c.bf16 %v81_v30, %v79_v29 }
  0x43   :  { %299 = vmatmul.mubr.bf16.gmra.mrb[8].mxu0 %v94_v35  ;;  %v83_v35 = vld [vmem:[#allocation2 + $0x1c8] sm:$0xff] }
  0x44   :  { %306 = vmatprep.mubr.bf16.mxu0 %v97_v36  ;;  %v85_v36 = vld [vmem:[#allocation2 + $0x1d8] sm:$0xff] }
  0x45   :  { %v119_v38 = vpack.c.bf16 %v85_v36, %v83_v35 }
  0x4b   :  { %307 = vmatmul.mubr.bf16.gmra.mrb[12].mxu0 %v96_v41  ;;  %v87_v41 = vld [vmem:[#allocation2 + $0x1e8] sm:$0xff] }
  0x4c   :  { %314 = vmatprep.mubr.bf16.mxu0 %v99_v42  ;;  %v89_v42 = vld [vmem:[#allocation2 + $0x1f8] sm:$0xff] }
  0x4d   :  { %v121_v44 = vpack.c.bf16 %v89_v42, %v87_v41 }
  0x53   :  { %315 = vmatmul.mubr.bf16.gmra.mrb[16].mxu0 %v98_v47  ;;  %v120_v47 = vpack.c.bf16 %v88_v46, %v86_v45 }
  0x54   :  { %322 = vmatprep.mubr.bf16.mxu0 %v101_v48 }
  0x5b   :  { %323 = vmatmul.mubr.bf16.gmra.mrb[20].mxu0 %v100_v53 }
  0x5c   :  { %330 = vmatprep.mubr.bf16.mxu0 %v103_v54 }
  0x63   :  { %331 = vmatmul.mubr.bf16.gmra.mrb[24].mxu0 %v102_v59 }
  0x64   :  { %338 = vmatprep.mubr.bf16.mxu0 %v105_v60 }
  0x6b   :  { %339 = vmatmul.mubr.bf16.gmra.mrb[28].mxu0 %v104_v1 }
  0x6c   :  { %346 = vmatprep.mubr.bf16.mxu0 %v107_v2 }
  0x73   :  { %347 = vmatmul.mubr.bf16.gmra.mrb[32].mxu0 %v106_v7 }
  0x74   :  { %354 = vmatprep.mubr.bf16.mxu0 %v109_v8 }
  0x7b   :  { %355 = vmatmul.mubr.bf16.gmra.mrb[36].mxu0 %v108_v13 }
  0x7c   :  { %362 = vmatprep.mubr.bf16.mxu0 %v111_v14 }
  0x83   :  { %363 = vmatmul.mubr.bf16.gmra.mrb[40].mxu0 %v110_v19 }
  0x84   :  { %370 = vmatprep.mubr.bf16.mxu0 %v113_v20 }
  0x8b   :  { %371 = vmatmul.mubr.bf16.gmra.mrb[44].mxu0 %v112_v25 }
  0x8c   :  { %378 = vmatprep.mubr.bf16.mxu0 %v115_v26 }
  0x93   :  { %379 = vmatmul.mubr.bf16.gmra.mrb[48].mxu0 %v114_v31 }
  0x94   :  { %386 = vmatprep.mubr.bf16.mxu0 %v117_v32 }
  0x9b   :  { %387 = vmatmul.mubr.bf16.gmra.mrb[52].mxu0 %v116_v37 }
  0x9c   :  { %394 = vmatprep.mubr.bf16.mxu0 %v119_v38 }
  0xa3   :  { %395 = vmatmul.mubr.bf16.gmra.mrb[56].mxu0 %v118_v43 }
  0xa4   :  { %402 = vmatprep.mubr.bf16.mxu0 %v121_v44 }
  0xab   :  { %403 = vmatmul.mubr.bf16.gmra.mrb[60].mxu0 %v120_v47 }
 0x106   :  { %v1464_v48 = vpop.f32.mrb[0].mxu0 }
 0x107   :  { %v1465_v49 = vpop.f32.mrb[1].mxu0 }
 0x108   :  { %v1466_v50 = vadd.f32 %v1465_v49, %v1464_v48  ;;  %v1467_v51 = vpop.f32.mrb[2].mxu0 }
 0x109   :  { %v1468_v52 = vpop.f32.mrb[3].mxu0 }
 0x10a   :  { %v1469_v53 = vadd.f32 %v1468_v52, %v1467_v51 }
 0x10c   :  { %v2021_v54 = vpack.c.bf16 %v1469_v53, %v1466_v50 }
 0x10e   :  { %v1470_v55 = vpop.f32.mrb[4].mxu0  ;;  %435 = vrot.lane.b32.xlu0 %v2021_v54, %s1944_s1  ;;  %1752 = vmatprep.subr.msk.bf16.mxu1 %vm2779_vm0, %v2021_v54  ;;  %v477_v56 = vsel %vm2779_vm0, %v2021_v54, 0 }
 0x10f   :  { %v1471_v57 = vpop.f32.mrb[5].mxu0  ;;  %1625 = vmatpush3.bf16.xpose.msra.mxu1 %v477_v56 }
 0x110   :  { %v1472_v58 = vadd.f32 %v1471_v57, %v1470_v55  ;;  %v1473_v59 = vpop.f32.mrb[6].mxu0 }
 0x111   :  { %v1474_v60 = vpop.f32.mrb[7].mxu0 }
 0x112   :  { %v1475_v61 = vadd.f32 %v1474_v60, %v1473_v59 }
 0x114   :  { %v2029_v62 = vpack.c.bf16 %v1475_v61, %v1472_v58 }
 0x116   :  { %v1476_v63 = vpop.f32.mrb[8].mxu0  ;;  %437 = vrot.lane.b32.xlu0 %v2029_v62, %s1944_s1  ;;  %1753 = vmatprep.subr.msk.bf16.mxu1 %vm2779_vm0, %v2029_v62  ;;  %v480_v0 = vsel %vm2779_vm0, %v2029_v62, 0 }
 0x117   :  { %v1477_v1 = vpop.f32.mrb[9].mxu0  ;;  %1627 = vmatpush3.bf16.xpose.msra.mxu1 %v480_v0 }
 0x118   :  { %v1478_v2 = vadd.f32 %v1477_v1, %v1476_v63  ;;  %v1479_v3 = vpop.f32.mrb[10].mxu0 }
 0x119   :  { %v1480_v4 = vpop.f32.mrb[11].mxu0 }
 0x11a   :  { %v1481_v5 = vadd.f32 %v1480_v4, %v1479_v3 }
 0x11c   :  { %v2037_v6 = vpack.c.bf16 %v1481_v5, %v1478_v2 }
 0x11e   :  { %v1482_v7 = vpop.f32.mrb[12].mxu0  ;;  %439 = vrot.lane.b32.xlu1 %v2037_v6, %s1944_s1  ;;  %1754 = vmatprep.subr.msk.bf16.mxu1 %vm2779_vm0, %v2037_v6  ;;  %v483_v8 = vsel %vm2779_vm0, %v2037_v6, 0 }
 0x11f   :  { %v1483_v9 = vpop.f32.mrb[13].mxu0  ;;  %1629 = vmatpush3.bf16.xpose.msra.mxu1 %v483_v8 }
 0x120   :  { %v1484_v10 = vadd.f32 %v1483_v9, %v1482_v7  ;;  %v1485_v11 = vpop.f32.mrb[14].mxu0 }
 0x121   :  { %v1486_v12 = vpop.f32.mrb[15].mxu0 }
 0x122   :  { %v1487_v13 = vadd.f32 %v1486_v12, %v1485_v11 }
 0x124   :  { %v2045_v14 = vpack.c.bf16 %v1487_v13, %v1484_v10 }
 0x126   :  { %v1488_v15 = vpop.f32.mrb[16].mxu0  ;;  %441 = vrot.lane.b32.xlu1 %v2045_v14, %s1944_s1  ;;  %1755 = vmatprep.subr.msk.bf16.mxu1 %vm2779_vm0, %v2045_v14  ;;  %v486_v16 = vsel %vm2779_vm0, %v2045_v14, 0 }
 0x127   :  { %v1489_v17 = vpop.f32.mrb[17].mxu0  ;;  %1631 = vmatpush3.bf16.xpose.msra.mxu1 %v486_v16 }
 0x128   :  { %v1490_v18 = vadd.f32 %v1489_v17, %v1488_v15  ;;  %v1491_v19 = vpop.f32.mrb[18].mxu0 }
 0x129   :  { %v1492_v20 = vpop.f32.mrb[19].mxu0 }
 0x12a   :  { %v1493_v21 = vadd.f32 %v1492_v20, %v1491_v19 }
 0x12c   :  { %v2053_v22 = vpack.c.bf16 %v1493_v21, %v1490_v18 }
 0x12e   :  { %v1494_v23 = vpop.f32.mrb[20].mxu0  ;;  %443 = vrot.lane.b32.xlu0 %v2053_v22, %s1944_s1  ;;  %1756 = vmatprep.subr.msk.bf16.mxu1 %vm2779_vm0, %v2053_v22  ;;  %v489_v24 = vsel %vm2779_vm0, %v2053_v22, 0 }
 0x12f   :  { %v1495_v25 = vpop.f32.mrb[21].mxu0  ;;  %1633 = vmatpush3.bf16.xpose.msra.mxu1 %v489_v24 }
 0x130   :  { %v1496_v26 = vadd.f32 %v1495_v25, %v1494_v23  ;;  %v1497_v27 = vpop.f32.mrb[22].mxu0 }
 0x131   :  { %v1498_v28 = vpop.f32.mrb[23].mxu0 }
 0x132   :  { %v1499_v29 = vadd.f32 %v1498_v28, %v1497_v27 }
 0x134   :  { %v2061_v30 = vpack.c.bf16 %v1499_v29, %v1496_v26 }
 0x136   :  { %v1500_v31 = vpop.f32.mrb[24].mxu0  ;;  %445 = vrot.lane.b32.xlu1 %v2061_v30, %s1944_s1  ;;  %1757 = vmatprep.subr.msk.bf16.mxu1 %vm2779_vm0, %v2061_v30  ;;  %v492_v32 = vsel %vm2779_vm0, %v2061_v30, 0 }
 0x137   :  { %v1501_v33 = vpop.f32.mrb[25].mxu0  ;;  %1635 = vmatpush3.bf16.xpose.msra.mxu1 %v492_v32 }
 0x138   :  { %v1502_v34 = vadd.f32 %v1501_v33, %v1500_v31  ;;  %v1503_v35 = vpop.f32.mrb[26].mxu0 }
 0x139   :  { %v1504_v36 = vpop.f32.mrb[27].mxu0 }
 0x13a   :  { %v1505_v37 = vadd.f32 %v1504_v36, %v1503_v35 }
 0x13c   :  { %v2069_v38 = vpack.c.bf16 %v1505_v37, %v1502_v34 }
 0x13e   :  { %v1506_v39 = vpop.f32.mrb[28].mxu0  ;;  %447 = vrot.lane.b32.xlu0 %v2069_v38, %s1944_s1  ;;  %1758 = vmatprep.subr.msk.bf16.mxu1 %vm2779_vm0, %v2069_v38  ;;  %v495_v40 = vsel %vm2779_vm0, %v2069_v38, 0 }
 0x13f   :  { %v1507_v41 = vpop.f32.mrb[29].mxu0  ;;  %1637 = vmatpush3.bf16.xpose.msra.mxu1 %v495_v40 }
 0x140   :  { %v1508_v42 = vadd.f32 %v1507_v41, %v1506_v39  ;;  %v1509_v43 = vpop.f32.mrb[30].mxu0 }
 0x141   :  { %v1510_v44 = vpop.f32.mrb[31].mxu0 }
 0x142   :  { %v1511_v45 = vadd.f32 %v1510_v44, %v1509_v43 }
 0x144   :  { %v2077_v46 = vpack.c.bf16 %v1511_v45, %v1508_v42 }
 0x146   :  { %v1512_v47 = vpop.f32.mrb[32].mxu0  ;;  %449 = vrot.lane.b32.xlu1 %v2077_v46, %s1944_s1  ;;  %1759 = vmatprep.subr.msk.bf16.mxu1 %vm2779_vm0, %v2077_v46  ;;  %v498_v48 = vsel %vm2779_vm0, %v2077_v46, 0 }
 0x147   :  { %v1513_v49 = vpop.f32.mrb[33].mxu0  ;;  %1639 = vmatpush3.bf16.xpose.msra.mxu1 %v498_v48 }
 0x148   :  { %v1514_v50 = vadd.f32 %v1513_v49, %v1512_v47  ;;  %v1515_v51 = vpop.f32.mrb[34].mxu0 }
 0x149   :  { %v1516_v52 = vpop.f32.mrb[35].mxu0 }
 0x14a   :  { %v1517_v53 = vadd.f32 %v1516_v52, %v1515_v51 }
 0x14c   :  { %v2085_v55 = vpack.c.bf16 %v1517_v53, %v1514_v50 }
 0x14e   :  { %v1518_v56 = vpop.f32.mrb[36].mxu0  ;;  %605 = vrot.lane.b32.xlu0 %v2085_v55, %s1944_s1  ;;  %1760 = vmatprep.subr.msk.bf16.mxu1 %vm2779_vm0, %v2085_v55  ;;  %v646_v50 = vsel %vm2779_vm0, %v2085_v55, 0 }
 0x14f   :  { %v1519_v57 = vpop.f32.mrb[37].mxu0 }
 0x150   :  { %v1520_v58 = vadd.f32 %v1519_v57, %v1518_v56  ;;  %v1521_v59 = vpop.f32.mrb[38].mxu0 }
 0x151   :  { %v1522_v60 = vpop.f32.mrb[39].mxu0 }
 0x152   :  { %v1523_v61 = vadd.f32 %v1522_v60, %v1521_v59 }
 0x154   :  { %v2091_v63 = vpack.c.bf16 %v1523_v61, %v1520_v58 }
 0x156   :  { %v1524_v0 = vpop.f32.mrb[40].mxu0  ;;  %607 = vrot.lane.b32.xlu1 %v2091_v63, %s1944_s1  ;;  %v649_v52 = vsel %vm2779_vm0, %v2091_v63, 0 }
 0x157   :  { %v1525_v1 = vpop.f32.mrb[41].mxu0 }
 0x158   :  { %v1526_v2 = vadd.f32 %v1525_v1, %v1524_v0  ;;  %v1527_v3 = vpop.f32.mrb[42].mxu0 }
 0x159   :  { %v1528_v4 = vpop.f32.mrb[43].mxu0 }
 0x15a   :  { %v1529_v5 = vadd.f32 %v1528_v4, %v1527_v3 }
 0x15c   :  { %v2095_v7 = vpack.c.bf16 %v1529_v5, %v1526_v2 }
 0x15e   :  { %v1530_v8 = vpop.f32.mrb[44].mxu0  ;;  %609 = vrot.lane.b32.xlu0 %v2095_v7, %s1944_s1 }
 0x15f   :  { %v1531_v9 = vpop.f32.mrb[45].mxu0 }
 0x160   :  { %v1532_v10 = vadd.f32 %v1531_v9, %v1530_v8  ;;  %v1533_v11 = vpop.f32.mrb[46].mxu0 }
 0x161   :  { %v1534_v12 = vpop.f32.mrb[47].mxu0 }
 0x162   :  { %v1535_v13 = vadd.f32 %v1534_v12, %v1533_v11 }
 0x164   :  { %v2099_v15 = vpack.c.bf16 %v1535_v13, %v1532_v10 }
 0x166   :  { %v1536_v16 = vpop.f32.mrb[48].mxu0  ;;  %611 = vrot.lane.b32.xlu1 %v2099_v15, %s1944_s1  ;;  %v655_v53 = vsel %vm2779_vm0, %v2099_v15, 0 }
 0x167   :  { %v1537_v17 = vpop.f32.mrb[49].mxu0 }
 0x168   :  { %v1538_v18 = vadd.f32 %v1537_v17, %v1536_v16  ;;  %v1539_v19 = vpop.f32.mrb[50].mxu0 }
 0x169   :  { %v1540_v20 = vpop.f32.mrb[51].mxu0 }
 0x16a   :  { %v1541_v21 = vadd.f32 %v1540_v20, %v1539_v19 }
 0x16c   :  { %v2103_v23 = vpack.c.bf16 %v1541_v21, %v1538_v18  ;;  %v766_v18 = vlaneseq }
 0x16e   :  { %v1542_v24 = vpop.f32.mrb[52].mxu0  ;;  %613 = vrot.lane.b32.xlu0 %v2103_v23, %s1944_s1  ;;  %v2185_v19 = vshrl.u32 %v766_v18, 7  ;;  %v2190_v21 = vand.u32 127, %v766_v18 }
 0x16f   :  { %v1543_v25 = vpop.f32.mrb[53].mxu0 }
 0x170   :  { %v1544_v26 = vadd.f32 %v1543_v25, %v1542_v24  ;;  %v1545_v27 = vpop.f32.mrb[54].mxu0  ;;  %v2188_v20 = vadd.s32 16, %v2185_v19  ;;  %vm785_vm2 = vcmp.le.s32.totalorder %v2190_v21, %v2185_v19  ;;  %v2200_v24 = vadd.s32 24, %v2185_v19 }
 0x171   :  { %v1546_v28 = vpop.f32.mrb[55].mxu0 }
 0x172   :  { %v1547_v29 = vadd.f32 %v1546_v28, %v1545_v27  ;;  %vm787_vm1 = vcmp.le.s32.totalorder %v2190_v21, %v2188_v20  ;;  %vm788_vm4 = vcmp.le.s32.totalorder %v2190_v21, %v2200_v24 }
 0x174   :  { %v424_v31 = vpack.c.bf16 %v1547_v29, %v1544_v26 }
 0x176   :  { %v1548_v32 = vpop.f32.mrb[56].mxu0  ;;  %615 = vrot.lane.b32.xlu1 %v424_v31, %s1944_s1  ;;  %v661_v56 = vsel %vm2779_vm0, %v424_v31, 0 }
 0x177   :  { %v1549_v33 = vpop.f32.mrb[57].mxu0 }
 0x178   :  { %v1550_v34 = vadd.f32 %v1549_v33, %v1548_v32  ;;  %v1551_v35 = vpop.f32.mrb[58].mxu0 }
 0x179   :  { %v1552_v36 = vpop.f32.mrb[59].mxu0 }
 0x17a   :  { %v1553_v37 = vadd.f32 %v1552_v36, %v1551_v35  ;;  %v2234_v35 = vadd.s32 56, %v2185_v19  ;;  %v2239_v36 = vadd.s32 32, %v2185_v19 }
 0x17c   :  { %v2108_v39 = vpack.c.bf16 %v1553_v37, %v1550_v34  ;;  %v2231_v34 = vadd.s32 48, %v2185_v19  ;;  %vm792_vm6 = vcmp.le.s32.totalorder %v2190_v21, %v2234_v35  ;;  %vm789_vm7 = vcmp.le.s32.totalorder %v2190_v21, %v2239_v36 }
 0x17e   :  { %v1554_v40 = vpop.f32.mrb[60].mxu0  ;;  %617 = vrot.lane.b32.xlu0 %v2108_v39, %s1944_s1  ;;  %v664_v57 = vsel %vm2779_vm0, %v2108_v39, 0  ;;  %vm791_vm5 = vcmp.le.s32.totalorder %v2190_v21, %v2231_v34 }
 0x17f   :  { %v1555_v41 = vpop.f32.mrb[61].mxu0 }
 0x180   :  { %v1556_v42 = vadd.f32 %v1555_v41, %v1554_v40  ;;  %v1557_v43 = vpop.f32.mrb[62].mxu0  ;;  %v436_v44 = vpop.permute.xlu0 %435  ;;  %v2244_v40 = vadd.s32 40, %v2185_v19 }
 0x181   :  { %v1558_v45 = vpop.f32.mrb[63].mxu0  ;;  %1640 = vmatprep.mubr.msk.bf16.mxu1 %vm2779_vm0, %v436_v44 }
 0x182   :  { %v1559_v47 = vadd.f32 %v1558_v45, %v1557_v43  ;;  %1258 = vrot.lane.b32.xlu0 %v2085_v55, %s1945_s26  ;;  %vm790_vm8 = vcmp.le.s32.totalorder %v2190_v21, %v2244_v40 }
 0x184   :  { %v2115_v48 = vpack.c.bf16 %v1559_v47, %v1556_v42 }
 0x186   :  { %619 = vrot.lane.b32.xlu1 %v2115_v48, %s1944_s1  ;;  %1260 = vrot.lane.b32.xlu0 %v2091_v63, %s1945_s26  ;;  %v667_v58 = vsel %vm2779_vm0, %v2115_v48, 0 }
 0x188   :  { %v438_v49 = vpop.permute.xlu0 %437 }
 0x189   :  { %1641 = vmatmul.mubr.msk.bf16.vlgmr.msra.gmra.mrb[0].mxu1 %vm2779_vm0, %v438_v49 }
 0x18a   :  { %1657 = vmatpush3.bf16.xpose.msra.mxu1 %v646_v50  ;;  %1137 = vrot.lane.b32.xlu1 %v2021_v54, %s1945_s26  ;;  %v2275_v50 = vadd.s32 80, %v2185_v19 }
 0x18b   :  { %1264 = vrot.lane.b32.xlu0 %v2099_v15, %s1945_s26  ;;  %1761 = vmatprep.subr.msk.bf16.mxu1 %vm2779_vm0, %v2091_v63 }
 0x18c   :  { %vm795_vm9 = vcmp.le.s32.totalorder %v2190_v21, %v2275_v50 }
 0x18e   :  { %1139 = vrot.lane.b32.xlu1 %v2029_v62, %s1945_s26  ;;  %v652_v62 = vsel %vm2779_vm0, %v2095_v7, 0 }
 0x18f   :  { %1268 = vrot.lane.b32.xlu0 %v424_v31, %s1945_s26 }
 0x190   :  { %v440_v51 = vpop.permute.xlu1 %439 }
 0x191   :  { %1644 = vmatprep.mubr.msk.bf16.mxu1 %vm2779_vm0, %v440_v51  ;;  %v2278_v51 = vadd.s32 88, %v2185_v19 }
 0x192   :  { %1659 = vmatpush3.bf16.xpose.msra.mxu1 %v649_v52  ;;  %1141 = vrot.lane.b32.xlu1 %v2037_v6, %s1945_s26  ;;  %v2283_v52 = vadd.s32 64, %v2185_v19 }
 0x193   :  { %1762 = vmatprep.subr.msk.bf16.mxu1 %vm2779_vm0, %v2095_v7  ;;  %vm796_vm10 = vcmp.le.s32.totalorder %v2190_v21, %v2278_v51 }
 0x194   :  { %vm793_vm11 = vcmp.le.s32.totalorder %v2190_v21, %v2283_v52 }
 0x196   :  { %1262 = vrot.lane.b32.xlu1 %v2095_v7, %s1945_s26 }
 0x198   :  { %v442_v54 = vpop.permute.xlu1 %441 }
 0x199   :  { %1645 = vmatmul.mubr.msk.bf16.gmra.mrb[4].mxu1 %vm2779_vm0, %v442_v54 }
 0x19a   :  { %1661 = vmatpush3.bf16.xpose.msra.mxu1 %v652_v62  ;;  %1143 = vrot.lane.b32.xlu1 %v2045_v14, %s1945_s26  ;;  %v2288_v62 = vadd.s32 72, %v2185_v19 }
 0x19b   :  { %1763 = vmatprep.subr.msk.bf16.mxu1 %vm2779_vm0, %v2099_v15 }
 0x19c   :  { %vm794_vm12 = vcmp.le.s32.totalorder %v2190_v21, %v2288_v62 }
 0x19e   :  { %1145 = vrot.lane.b32.xlu1 %v2053_v22, %s1945_s26  ;;  %v658_v22 = vsel %vm2779_vm0, %v2103_v23, 0 }
 0x1a0   :  { %v444_v6 = vpop.permute.xlu0 %443 }
 0x1a1   :  { %1648 = vmatprep.mubr.msk.bf16.mxu1 %vm2779_vm0, %v444_v6 }
 0x1a2   :  { %1663 = vmatpush3.bf16.xpose.msra.mxu1 %v655_v53  ;;  %1266 = vrot.lane.b32.xlu1 %v2103_v23, %s1945_s26 }
 0x1a3   :  { %1764 = vmatprep.subr.msk.bf16.mxu1 %vm2779_vm0, %v2103_v23  ;;  %v2193_v23 = vadd.s32 8, %v2185_v19 }
 0x1a5   :  { %vm786_vm3 = vcmp.le.s32.totalorder %v2190_v21, %v2193_v23 }
 0x1a6   :  { %1147 = vrot.lane.b32.xlu1 %v2061_v30, %s1945_s26 }
 0x1a8   :  { %v446_v14 = vpop.permute.xlu1 %445 }
 0x1a9   :  { %1649 = vmatmul.mubr.msk.bf16.gmra.mrb[8].mxu1 %vm2779_vm0, %v446_v14 }
 0x1aa   :  { %1665 = vmatpush3.bf16.xpose.msra.mxu1 %v658_v22  ;;  %1149 = vrot.lane.b32.xlu1 %v2069_v38, %s1945_s26 }
 0x1ab   :  { %1765 = vmatprep.subr.msk.bf16.mxu1 %vm2779_vm0, %v424_v31 }
 0x1b0   :  { %v448_v55 = vpop.permute.xlu0 %447 }
 0x1b1   :  { %1652 = vmatprep.mubr.msk.bf16.mxu1 %vm2779_vm0, %v448_v55 }
 0x1b2   :  { %1667 = vmatpush3.bf16.xpose.msra.mxu1 %v661_v56 }
 0x1b3   :  { %1766 = vmatprep.subr.msk.bf16.mxu1 %vm2779_vm0, %v2108_v39 }
 0x1b8   :  { %v450_v30 = vpop.permute.xlu1 %449 }
 0x1b9   :  { %1653 = vmatmul.mubr.msk.bf16.gmra.mrb[12].mxu1 %vm2779_vm0, %v450_v30 }
 0x1ba   :  { %1669 = vmatpush3.bf16.xpose.msra.mxu1 %v664_v57  ;;  %v781_v57 = vadd.s32 112, %v2185_v19 }
 0x1bb   :  { %1767 = vmatprep.subr.msk.bf16.mxu1 %vm2779_vm0, %v2115_v48 }
 0x1bc   :  { %vm799_vm13 = vcmp.le.s32.totalorder %v2190_v21, %v781_v57 }
 0x1c0   :  { %v606_v38 = vpop.permute.xlu0 %605 }
 0x1c1   :  { %1672 = vmatprep.mubr.msk.bf16.mxu1 %vm2779_vm0, %v606_v38  ;;  %v2320_v38 = vadd.s32 120, %v2185_v19 }
 0x1c2   :  { %1671 = vmatpush3.bf16.xpose.msra.mxu1 %v667_v58  ;;  %v779_v58 = vadd.s32 96, %v2185_v19 }
 0x1c3   :  { %vm800_vm14 = vcmp.le.s32.totalorder %v2190_v21, %v2320_v38 }
 0x1c4   :  { %vm797_vm15 = vcmp.le.s32.totalorder %v2190_v21, %v779_v58 }
 0x1c8   :  { %v608_v59 = vpop.permute.xlu1 %607 }
 0x1c9   :  { %1673 = vmatmul.mubr.msk.bf16.vlgmr.msra.gmra.mrb[16].mxu1 %vm2779_vm0, %v608_v59 }
 0x1d0   :  { %v610_v60 = vpop.permute.xlu0 %609 }
 0x1d1   :  { %1676 = vmatprep.mubr.msk.bf16.mxu1 %vm2779_vm0, %v610_v60  ;;  %v780_v60 = vadd.s32 104, %v2185_v19 }
 0x1d8   :  { %v612_v61 = vpop.permute.xlu1 %611 }
 0x1d9   :  { %1677 = vmatmul.mubr.msk.bf16.gmra.mrb[20].mxu1 %vm2779_vm0, %v612_v61 }
 0x1e0   :  { %v614_v63 = vpop.permute.xlu0 %613 }
 0x1e1   :  { %1680 = vmatprep.mubr.msk.bf16.mxu1 %vm2779_vm0, %v614_v63 }
 0x1e8   :  { %v616_v0 = vpop.permute.xlu1 %615 }
 0x1e9   :  { %1681 = vmatmul.mubr.msk.bf16.gmra.mrb[24].mxu1 %vm2779_vm0, %v616_v0 }
 0x1f0   :  { %v618_v1 = vpop.permute.xlu0 %617 }
 0x1f1   :  { %1684 = vmatprep.mubr.msk.bf16.mxu1 %vm2779_vm0, %v618_v1 }
 0x1f4   :  { %v1259_v2 = vpop.permute.xlu0 %1258 }
 0x1f5   :  { %1720 = vmatprep.subr.bf16.mxu1 %v1259_v2 }
 0x1f6   :  { %1721 = vmatpush3.bf16.msra.mxu1 %v1259_v2 }
 0x1f8   :  { %v620_v3 = vpop.permute.xlu1 %619  ;;  %v1261_v4 = vpop.permute.xlu0 %1260 }
 0x1f9   :  { %1685 = vmatmul.mubr.msk.bf16.gmra.mrb[28].mxu1 %vm2779_vm0, %v620_v3  ;;  %1722 = vmatprep.subr.bf16.mxu1 %v1261_v4  ;;  %vm798_vm0 = vcmp.le.s32.totalorder %v2190_v21, %v780_v60 }
 0x1fa   :  { %1723 = vmatpush3.bf16.msra.mxu1 %v1261_v4 }
 0x1fc   :  { %v1138_v5 = vpop.permute.xlu1 %1137 }
 0x1fd   :  { %1688 = vmatprep.subr.bf16.mxu0 %v1138_v5  ;;  %v1265_v10 = vpop.permute.xlu0 %1264 }
 0x1fe   :  { %1689 = vmatpush3.bf16.msra.mxu0 %v1138_v5 }
 0x200   :  { %v1140_v7 = vpop.permute.xlu1 %1139 }
 0x201   :  { %1690 = vmatprep.subr.bf16.mxu0 %v1140_v7  ;;  %v1269_v15 = vpop.permute.xlu0 %1268 }
 0x202   :  { %1691 = vmatpush3.bf16.msra.mxu0 %v1140_v7 }
 0x204   :  { %v1142_v8 = vpop.permute.xlu1 %1141 }
 0x205   :  { %1692 = vmatprep.subr.bf16.mxu0 %v1142_v8 }
 0x206   :  { %1693 = vmatpush3.bf16.msra.mxu0 %v1142_v8 }
 0x208   :  { %v1263_v9 = vpop.permute.xlu1 %1262 }
 0x209   :  { %1724 = vmatprep.subr.bf16.mxu1 %v1263_v9 }
 0x20a   :  { %1725 = vmatpush3.bf16.msra.mxu1 %v1263_v9 }
 0x20b   :  { %1726 = vmatprep.subr.bf16.mxu1 %v1265_v10 }
 0x20c   :  { %v1144_v11 = vpop.permute.xlu1 %1143 }
 0x20d   :  { %1694 = vmatprep.subr.bf16.mxu0 %v1144_v11 }
 0x20e   :  { %1695 = vmatpush3.bf16.msra.mxu0 %v1144_v11  ;;  %1727 = vmatpush3.bf16.msra.mxu1 %v1265_v10 }
 0x210   :  { %v1146_v12 = vpop.permute.xlu1 %1145 }
 0x211   :  { %1696 = vmatprep.subr.bf16.mxu0 %v1146_v12 }
 0x212   :  { %1697 = vmatpush3.bf16.msra.mxu0 %v1146_v12 }
 0x214   :  { %v1267_v13 = vpop.permute.xlu1 %1266 }
 0x215   :  { %1728 = vmatprep.subr.bf16.mxu1 %v1267_v13 }
 0x216   :  { %1729 = vmatpush3.bf16.msra.mxu1 %v1267_v13 }
 0x217   :  { %1730 = vmatprep.subr.bf16.mxu1 %v1269_v15 }
 0x218   :  { %v1148_v16 = vpop.permute.xlu1 %1147 }
 0x219   :  { %1698 = vmatprep.subr.bf16.mxu0 %v1148_v16 }
 0x21a   :  { %1699 = vmatpush3.bf16.msra.mxu0 %v1148_v16  ;;  %1731 = vmatpush3.bf16.msra.mxu1 %v1269_v15 }
 0x21c   :  { %v1150_v17 = vpop.permute.xlu1 %1149 }
 0x21d   :  { %1700 = vmatprep.subr.bf16.mxu0 %v1150_v17 }
 0x21e   :  { %1701 = vmatpush3.bf16.msra.mxu0 %v1150_v17 }
 0x25c   :  { %v1642_v25 = vpop.f32.mrb[0].mxu1 }
 0x25d   :  { %v534_v26 = vpop.f32.mrb[1].mxu1  ;;  %v2205_v27 = vsel %vm787_vm1, %v1642_v25, -inf }
 0x25e   :  { %837 = vmax.xlane.f32.xlu1 %v2205_v27  ;;  %v1643_v28 = vpop.f32.mrb[2].mxu1  ;;  %v2213_v29 = vsel %vm785_vm2, %v534_v26, -inf }
 0x25f   :  { %833 = vmax.xlane.f32.xlu0 %v2213_v29  ;;  %v537_v31 = vpop.f32.mrb[3].mxu1  ;;  %v2227_v33 = vsel %vm788_vm4, %v1643_v28, -inf }
 0x260   :  { %v2221_v32 = vsel %vm786_vm3, %v537_v31, -inf }
 0x262   :  { %835 = vmax.xlane.f32.xlu1 %v2221_v32 }
 0x263   :  { %839 = vmax.xlane.f32.xlu0 %v2227_v33 }
 0x26c   :  { %v1646_v37 = vpop.f32.mrb[4].mxu1 }
 0x26d   :  { %v550_v41 = vpop.f32.mrb[5].mxu1  ;;  %v2249_v42 = vsel %vm791_vm5, %v1646_v37, -inf }
 0x26e   :  { %845 = vmax.xlane.f32.xlu1 %v2249_v42  ;;  %v1647_v43 = vpop.f32.mrb[6].mxu1  ;;  %v2265_v47 = vsel %vm789_vm7, %v550_v41, -inf }
 0x26f   :  { %v553_v44 = vpop.f32.mrb[7].mxu1  ;;  %v2257_v45 = vsel %vm792_vm6, %v1647_v43, -inf }
 0x270   :  { %847 = vmax.xlane.f32.xlu0 %v2257_v45  ;;  %v2271_v49 = vsel %vm790_vm8, %v553_v44, -inf }
 0x272   :  { %841 = vmax.xlane.f32.xlu1 %v2265_v47 }
 0x274   :  { %843 = vmax.xlane.f32.xlu0 %v2271_v49 }
 0x27c   :  { %v1650_v54 = vpop.f32.mrb[8].mxu1 }
 0x27d   :  { %v566_v6 = vpop.f32.mrb[9].mxu1  ;;  %v2293_v53 = vsel %vm795_vm9, %v1650_v54, -inf }
 0x27e   :  { %853 = vmax.xlane.f32.xlu1 %v2293_v53  ;;  %v1651_v14 = vpop.f32.mrb[10].mxu1  ;;  %v2309_v56 = vsel %vm793_vm11, %v566_v6, -inf }
 0x27f   :  { %v569_v22 = vpop.f32.mrb[11].mxu1  ;;  %v2301_v55 = vsel %vm796_vm10, %v1651_v14, -inf }
 0x280   :  { %855 = vmax.xlane.f32.xlu0 %v2301_v55  ;;  %v2315_v30 = vsel %vm794_vm12, %v569_v22, -inf }
 0x282   :  { %849 = vmax.xlane.f32.xlu1 %v2309_v56 }
 0x284   :  { %851 = vmax.xlane.f32.xlu0 %v2315_v30 }
 0x28c   :  { %v1654_v59 = vpop.f32.mrb[12].mxu1 }
 0x28d   :  { %v582_v61 = vpop.f32.mrb[13].mxu1  ;;  %v2329_v63 = vsel %vm799_vm13, %v1654_v59, -inf }
 0x28e   :  { %861 = vmax.xlane.f32.xlu1 %v2329_v63  ;;  %v1655_v0 = vpop.f32.mrb[14].mxu1  ;;  %v2342_v3 = vsel %vm797_vm15, %v582_v61, -inf }
 0x28f   :  { %v585_v1 = vpop.f32.mrb[15].mxu1  ;;  %v2336_v2 = vsel %vm800_vm14, %v1655_v0, -inf }
 0x290   :  { %863 = vmax.xlane.f32.xlu0 %v2336_v2  ;;  %v2347_v4 = vsel %vm798_vm0, %v585_v1, -inf }
 0x292   :  { %857 = vmax.xlane.f32.xlu1 %v2342_v3 }
 0x294   :  { %859 = vmax.xlane.f32.xlu0 %v2347_v4 }
 0x29c   :  { %v1674_v5 = vpop.f32.mrb[16].mxu1 }
 0x29d   :  { %v703_v7 = vpop.f32.mrb[17].mxu1  ;;  %v2353_v8 = vsel %vm787_vm1, %v1674_v5, -inf }
 0x29e   :  { %869 = vmax.xlane.f32.xlu1 %v2353_v8  ;;  %v1675_v9 = vpop.f32.mrb[18].mxu1  ;;  %v2359_v10 = vsel %vm785_vm2, %v703_v7, -inf }
 0x29f   :  { %865 = vmax.xlane.f32.xlu0 %v2359_v10  ;;  %v706_v11 = vpop.f32.mrb[19].mxu1  ;;  %v2365_v12 = vsel %vm788_vm4, %v1675_v9, -inf }
 0x2a0   :  { %v2370_v13 = vsel %vm786_vm3, %v706_v11, -inf }
 0x2a3   :  { %871 = vmax.xlane.f32.xlu0 %v2365_v12 }
 0x2a7   :  { %867 = vmax.xlane.f32.xlu0 %v2370_v13 }
 0x2ac   :  { %v1678_v15 = vpop.f32.mrb[20].mxu1 }
 0x2ad   :  { %v719_v16 = vpop.f32.mrb[21].mxu1  ;;  %v2377_v17 = vsel %vm791_vm5, %v1678_v15, -inf }
 0x2ae   :  { %877 = vmax.xlane.f32.xlu1 %v2377_v17  ;;  %v1679_v18 = vpop.f32.mrb[22].mxu1  ;;  %v2383_v19 = vsel %vm789_vm7, %v719_v16, -inf }
 0x2af   :  { %v722_v20 = vpop.f32.mrb[23].mxu1  ;;  %v2388_v23 = vsel %vm792_vm6, %v1679_v18, -inf }
 0x2b0   :  { %879 = vmax.xlane.f32.xlu0 %v2388_v23  ;;  %v2394_v24 = vsel %vm790_vm8, %v722_v20, -inf }
 0x2b2   :  { %873 = vmax.xlane.f32.xlu1 %v2383_v19 }
 0x2b4   :  { %875 = vmax.xlane.f32.xlu0 %v2394_v24 }
 0x2bc   :  { %v1682_v25 = vpop.f32.mrb[24].mxu1 }
 0x2bd   :  { %v735_v26 = vpop.f32.mrb[25].mxu1  ;;  %v2401_v28 = vsel %vm795_vm9, %v1682_v25, -inf }
 0x2be   :  { %885 = vmax.xlane.f32.xlu1 %v2401_v28  ;;  %v1683_v31 = vpop.f32.mrb[26].mxu1  ;;  %v2407_v34 = vsel %vm793_vm11, %v735_v26, -inf }
 0x2bf   :  { %v738_v35 = vpop.f32.mrb[27].mxu1  ;;  %v2412_v36 = vsel %vm796_vm10, %v1683_v31, -inf }
 0x2c0   :  { %887 = vmax.xlane.f32.xlu0 %v2412_v36  ;;  %v2418_v37 = vsel %vm794_vm12, %v738_v35, -inf }
 0x2c2   :  { %881 = vmax.xlane.f32.xlu1 %v2407_v34 }
 0x2c4   :  { %883 = vmax.xlane.f32.xlu0 %v2418_v37 }
 0x2cc   :  { %v1686_v40 = vpop.f32.mrb[28].mxu1 }
 0x2cd   :  { %v751_v41 = vpop.f32.mrb[29].mxu1  ;;  %v2424_v43 = vsel %vm799_vm13, %v1686_v40, -inf }
 0x2ce   :  { %893 = vmax.xlane.f32.xlu1 %v2424_v43  ;;  %v1687_v44 = vpop.f32.mrb[30].mxu1  ;;  %v2429_v50 = vsel %vm797_vm15, %v751_v41, -inf }
 0x2cf   :  { %v754_v51 = vpop.f32.mrb[31].mxu1  ;;  %v2434_v52 = vsel %vm800_vm14, %v1687_v44, -inf }
 0x2d0   :  { %895 = vmax.xlane.f32.xlu0 %v2434_v52  ;;  %v2439_v54 = vsel %vm798_vm0, %v754_v51, -inf  ;;  %vm2780_vm0 = vcmask 261120  }
 0x2d1   :  { %vm2781_vm1 = vmmov %vm2780_vm0 }
 0x2d2   :  { %889 = vmax.xlane.f32.xlu1 %v2429_v50  ;;  %vm2782_vm2 = vmmov %vm2780_vm0 }
 0x2d3   :  { %vm2783_vm3 = vmmov %vm2780_vm0 }
 0x2d4   :  { %891 = vmax.xlane.f32.xlu0 %v2439_v54  ;;  %vm2784_vm4 = vmmov %vm2780_vm0 }
 0x2d5   :  { %vm2785_vm5 = vmmov %vm2780_vm0 }
 0x2d6   :  { %vm2786_vm6 = vmmov %vm2780_vm0 }
 0x2d7   :  { %vm2787_vm7 = vmmov %vm2780_vm0 }
 0x2d8   :  { %vm2788_vm8 = vmmov %vm2780_vm0 }
 0x2d9   :  { %vm2789_vm9 = vmmov %vm2780_vm0 }
 0x2da   :  { %vm2790_vm10 = vmmov %vm2780_vm0 }
 0x2db   :  { %vm2791_vm11 = vmmov %vm2780_vm0 }
 0x2dc   :  { %vm2792_vm12 = vmmov %vm2780_vm0 }
 0x2dd   :  { %vm2793_vm13 = vmmov %vm2780_vm0 }
 0x2de   :  { %vm2794_vm14 = vmmov %vm2780_vm0 }
 0x2df   :  { %vm2795_vm15 = vmmov %vm2780_vm0 }
 0x2e3   :  { %1270 = vrot.lane.b32.xlu1 %v2108_v39, %s1945_s26 }
 0x2eb   :  { %v838_v62 = vpop.xlane.xlu1 %837 }
 0x2ec   :  { %v834_v6 = vpop.xlane.xlu0 %833  ;;  %v899_v21 = vsub.f32 %v2205_v27, %v838_v62 }
 0x2ed   :  { %v897_v61 = vsub.f32 %v2213_v29, %v834_v6 }
 0x2ee   :  { %v933_v60 = vmul.f32 1.442695, %v899_v21 }
 0x2ef   :  { %v836_v14 = vpop.xlane.xlu1 %835  ;;  %v929_v39 = vmul.f32 1.442695, %v897_v61 }
 0x2f0   :  { %v840_v22 = vpop.xlane.xlu0 %839  ;;  %v898_v57 = vsub.f32 %v2221_v32, %v836_v14 }
 0x2f1   :  { %v900_v38 = vsub.f32 %v2227_v33, %v840_v22 }
 0x2f2   :  { %v931_v59 = vmul.f32 1.442695, %v898_v57 }
 0x2f3   :  { %v935_v58 = vmul.f32 1.442695, %v900_v38 }
 0x2f5   :  { %1789 = vpow2.f32 %v935_v58 }
 0x2f6   :  { %1791 = vpow2.f32 %v931_v59 }
 0x2f7   :  { %1793 = vpow2.f32 %v933_v60 }
 0x2f8   :  { %1795 = vpow2.f32 %v929_v39 }
 0x2fb   :  { %v846_v0 = vpop.xlane.xlu1 %845 }
 0x2fc   :  { %v903_v1 = vsub.f32 %v2249_v42, %v846_v0 }
 0x2fd   :  { %v848_v5 = vpop.xlane.xlu0 %847 }
 0x2fe   :  { %v941_v32 = vmul.f32 1.442695, %v903_v1  ;;  %v904_v33 = vsub.f32 %v2257_v45, %v848_v5 }
 0x2ff   :  { %v2450_v7 = vpop.eup %1789  ;;  %v842_v9 = vpop.xlane.xlu1 %841 }
 0x300   :  { %v901_v27 = vsub.f32 %v2265_v47, %v842_v9  ;;  %999 = vadd.xlane.f32.xlu0 %v2450_v7  ;;  %v2456_v16 = vpop.eup %1791  ;;  %1797 = vpow2.f32 %v941_v32  ;;  %v943_v42 = vmul.f32 1.442695, %v904_v33 }
 0x301   :  { %v844_v11 = vpop.xlane.xlu0 %843  ;;  %v2459_v20 = vpop.eup %1793 }
 0x302   :  { %v937_v29 = vmul.f32 1.442695, %v901_v27  ;;  %v902_v15 = vsub.f32 %v2271_v49, %v844_v11  ;;  %v2462_v45 = vpop.eup %1795 }
 0x304   :  { %1799 = vpow2.f32 %v937_v29  ;;  %v939_v18 = vmul.f32 1.442695, %v902_v15  ;;  %995 = vadd.xlane.f32.xlu0 %v2456_v16 }
 0x305   :  { %1801 = vpow2.f32 %v943_v42 }
 0x306   :  { %1803 = vpow2.f32 %v939_v18 }
 0x307   :  { %997 = vadd.xlane.f32.xlu1 %v2459_v20 }
 0x30a   :  { %v2466_v25 = vpop.eup %1797 }
 0x30b   :  { %v854_v47 = vpop.xlane.xlu1 %853  ;;  %993 = vadd.xlane.f32.xlu1 %v2462_v45 }
 0x30c   :  { %v907_v49 = vsub.f32 %v2293_v53, %v854_v47 }
 0x30d   :  { %v856_v26 = vpop.xlane.xlu0 %855 }
 0x30e   :  { %v2468_v31 = vpop.eup %1799  ;;  %v949_v35 = vmul.f32 1.442695, %v907_v49  ;;  %v908_v41 = vsub.f32 %v2301_v55, %v856_v26 }
 0x30f   :  { %v850_v40 = vpop.xlane.xlu1 %849  ;;  %1005 = vadd.xlane.f32.xlu1 %v2466_v25  ;;  %1001 = vadd.xlane.f32.xlu0 %v2468_v31  ;;  %v2474_v51 = vpop.eup %1801 }
 0x310   :  { %1805 = vpow2.f32 %v949_v35  ;;  %v905_v44 = vsub.f32 %v2309_v56, %v850_v40  ;;  %v2476_v53 = vpop.eup %1803  ;;  %v951_v22 = vmul.f32 1.442695, %v908_v41 }
 0x311   :  { %v852_v62 = vpop.xlane.xlu0 %851 }
 0x312   :  { %v945_v6 = vmul.f32 1.442695, %v905_v44  ;;  %v906_v14 = vsub.f32 %v2315_v30, %v852_v62 }
 0x313   :  { %1003 = vadd.xlane.f32.xlu1 %v2476_v53  ;;  %1007 = vadd.xlane.f32.xlu0 %v2474_v51 }
 0x314   :  { %1807 = vpow2.f32 %v945_v6  ;;  %v947_v57 = vmul.f32 1.442695, %v906_v14 }
 0x316   :  { %1809 = vpow2.f32 %v947_v57 }
 0x317   :  { %1811 = vpow2.f32 %v951_v22 }
 0x31a   :  { %v2481_v55 = vpop.eup %1805 }
 0x31b   :  { %v862_v56 = vpop.xlane.xlu1 %861  ;;  %1013 = vadd.xlane.f32.xlu1 %v2481_v55 }
 0x31c   :  { %v911_v38 = vsub.f32 %v2329_v63, %v862_v56 }
 0x31d   :  { %v864_v58 = vpop.xlane.xlu0 %863 }
 0x31e   :  { %v2485_v21 = vpop.eup %1807  ;;  %v957_v30 = vmul.f32 1.442695, %v911_v38  ;;  %v912_v61 = vsub.f32 %v2336_v2, %v864_v58 }
 0x31f   :  { %v858_v59 = vpop.xlane.xlu1 %857  ;;  %1009 = vadd.xlane.f32.xlu0 %v2485_v21 }
 0x320   :  { %v2488_v60 = vpop.eup %1809  ;;  %1813 = vpow2.f32 %v957_v30  ;;  %v909_v0 = vsub.f32 %v2342_v3, %v858_v59  ;;  %v959_v32 = vmul.f32 1.442695, %v912_v61 }
 0x321   :  { %v860_v39 = vpop.xlane.xlu0 %859  ;;  %1011 = vadd.xlane.f32.xlu1 %v2488_v60  ;;  %v2493_v1 = vpop.eup %1811 }
 0x322   :  { %v953_v63 = vmul.f32 1.442695, %v909_v0  ;;  %v910_v5 = vsub.f32 %v2347_v4, %v860_v39 }
 0x323   :  { %1015 = vadd.xlane.f32.xlu0 %v2493_v1 }
 0x324   :  { %1815 = vpow2.f32 %v953_v63  ;;  %v955_v33 = vmul.f32 1.442695, %v910_v5 }
 0x326   :  { %1817 = vpow2.f32 %v955_v33 }
 0x327   :  { %1819 = vpow2.f32 %v959_v32 }
 0x32a   :  { %v2497_v9 = vpop.eup %1813 }
 0x32b   :  { %v870_v2 = vpop.xlane.xlu1 %869  ;;  %1021 = vadd.xlane.f32.xlu1 %v2497_v9 }
 0x32c   :  { %v915_v3 = vsub.f32 %v2353_v8, %v870_v2  ;;  %v866_v27 = vpop.xlane.xlu0 %865 }
 0x32d   :  { %v913_v11 = vsub.f32 %v2359_v10, %v866_v27 }
 0x32e   :  { %v2502_v29 = vpop.eup %1815  ;;  %v965_v4 = vmul.f32 1.442695, %v915_v3 }
 0x32f   :  { %1017 = vadd.xlane.f32.xlu0 %v2502_v29  ;;  %v961_v42 = vmul.f32 1.442695, %v913_v11 }
 0x330   :  { %v2505_v15 = vpop.eup %1817  ;;  %1821 = vpow2.f32 %v965_v4  ;;  %v872_v18 = vpop.xlane.xlu0 %871 }
 0x331   :  { %v916_v47 = vsub.f32 %v2365_v12, %v872_v18  ;;  %1019 = vadd.xlane.f32.xlu1 %v2505_v15  ;;  %v2509_v49 = vpop.eup %1819  ;;  %1823 = vpow2.f32 %v961_v42 }
 0x333   :  { %v967_v8 = vmul.f32 1.442695, %v916_v47  ;;  %1023 = vadd.xlane.f32.xlu0 %v2509_v49 }
 0x334   :  { %v868_v10 = vpop.xlane.xlu0 %867 }
 0x335   :  { %1825 = vpow2.f32 %v967_v8  ;;  %v914_v26 = vsub.f32 %v2370_v13, %v868_v10 }
 0x337   :  { %v963_v35 = vmul.f32 1.442695, %v914_v26 }
 0x339   :  { %1827 = vpow2.f32 %v963_v35 }
 0x33a   :  { %v2513_v40 = vpop.eup %1821 }
 0x33b   :  { %v878_v41 = vpop.xlane.xlu1 %877  ;;  %1029 = vadd.xlane.f32.xlu1 %v2513_v40  ;;  %v2517_v62 = vpop.eup %1823 }
 0x33c   :  { %v919_v12 = vsub.f32 %v2377_v17, %v878_v41 }
 0x33d   :  { %v880_v44 = vpop.xlane.xlu0 %879 }
 0x33e   :  { %v973_v6 = vmul.f32 1.442695, %v919_v12  ;;  %v920_v13 = vsub.f32 %v2388_v23, %v880_v44 }
 0x33f   :  { %v2519_v14 = vpop.eup %1825  ;;  %v874_v22 = vpop.xlane.xlu1 %873  ;;  %1025 = vadd.xlane.f32.xlu1 %v2517_v62 }
 0x340   :  { %1829 = vpow2.f32 %v973_v6  ;;  %v917_v57 = vsub.f32 %v2383_v19, %v874_v22  ;;  %1031 = vadd.xlane.f32.xlu0 %v2519_v14  ;;  %v975_v17 = vmul.f32 1.442695, %v920_v13 }
 0x341   :  { %v876_v56 = vpop.xlane.xlu0 %875 }
 0x342   :  { %v969_v38 = vmul.f32 1.442695, %v917_v57  ;;  %v918_v30 = vsub.f32 %v2394_v24, %v876_v56 }
 0x343   :  { %v2525_v58 = vpop.eup %1827 }
 0x344   :  { %1831 = vpow2.f32 %v969_v38  ;;  %1027 = vadd.xlane.f32.xlu0 %v2525_v58  ;;  %v971_v59 = vmul.f32 1.442695, %v918_v30 }
 0x345   :  { %1833 = vpow2.f32 %v975_v17 }
 0x346   :  { %1835 = vpow2.f32 %v971_v59 }
 0x34a   :  { %v2529_v61 = vpop.eup %1829 }
 0x34b   :  { %v886_v0 = vpop.xlane.xlu1 %885  ;;  %1037 = vadd.xlane.f32.xlu1 %v2529_v61 }
 0x34c   :  { %v923_v19 = vsub.f32 %v2401_v28, %v886_v0 }
 0x34d   :  { %v888_v23 = vpop.xlane.xlu0 %887 }
 0x34e   :  { %v2533_v39 = vpop.eup %1831  ;;  %v981_v63 = vmul.f32 1.442695, %v923_v19  ;;  %v924_v24 = vsub.f32 %v2412_v36, %v888_v23 }
 0x34f   :  { %v882_v5 = vpop.xlane.xlu1 %881  ;;  %1033 = vadd.xlane.f32.xlu0 %v2533_v39  ;;  %v2538_v2 = vpop.eup %1833 }
 0x350   :  { %1837 = vpow2.f32 %v981_v63  ;;  %v921_v32 = vsub.f32 %v2407_v34, %v882_v5  ;;  %v983_v27 = vmul.f32 1.442695, %v924_v24  ;;  %v2542_v11 = vpop.eup %1835 }
 0x351   :  { %v884_v33 = vpop.xlane.xlu0 %883 }
 0x352   :  { %v977_v3 = vmul.f32 1.442695, %v921_v32  ;;  %v922_v28 = vsub.f32 %v2418_v37, %v884_v33 }
 0x353   :  { %1039 = vadd.xlane.f32.xlu0 %v2538_v2 }
 0x354   :  { %1839 = vpow2.f32 %v977_v3  ;;  %v979_v4 = vmul.f32 1.442695, %v922_v28 }
 0x355   :  { %1841 = vpow2.f32 %v983_v27 }
 0x356   :  { %1843 = vpow2.f32 %v979_v4 }
 0x357   :  { %1035 = vadd.xlane.f32.xlu0 %v2542_v11 }
 0x35a   :  { %v2545_v42 = vpop.eup %1837 }
 0x35b   :  { %v894_v36 = vpop.xlane.xlu1 %893  ;;  %1045 = vadd.xlane.f32.xlu1 %v2545_v42 }
 0x35c   :  { %v927_v34 = vsub.f32 %v2424_v43, %v894_v36 }
 0x35d   :  { %v896_v18 = vpop.xlane.xlu0 %895 }
 0x35e   :  { %v2549_v47 = vpop.eup %1839  ;;  %v989_v8 = vmul.f32 1.442695, %v927_v34  ;;  %v928_v37 = vsub.f32 %v2434_v52, %v896_v18 }
 0x35f   :  { %v890_v10 = vpop.xlane.xlu1 %889  ;;  %1041 = vadd.xlane.f32.xlu0 %v2549_v47  ;;  %v2554_v41 = vpop.eup %1841 }
 0x360   :  { %1845 = vpow2.f32 %v989_v8  ;;  %v925_v26 = vsub.f32 %v2429_v50, %v890_v10  ;;  %v991_v43 = vmul.f32 1.442695, %v928_v37  ;;  %v2558_v22 = vpop.eup %1843 }
 0x361   :  { %v892_v35 = vpop.xlane.xlu0 %891 }
 0x362   :  { %v985_v12 = vmul.f32 1.442695, %v925_v26  ;;  %v926_v6 = vsub.f32 %v2439_v54, %v892_v35 }
 0x363   :  { %v1271_v44 = vpop.permute.xlu1 %1270  ;;  %1047 = vadd.xlane.f32.xlu0 %v2554_v41 }
 0x364   :  { %1847 = vpow2.f32 %v985_v12  ;;  %1732 = vmatprep.subr.bf16.mxu1 %v1271_v44  ;;  %v987_v52 = vmul.f32 1.442695, %v926_v6 }
 0x365   :  { %1733 = vmatpush3.bf16.msra.mxu1 %v1271_v44  ;;  %1849 = vpow2.f32 %v991_v43 }
 0x366   :  { %1851 = vpow2.f32 %v987_v52 }
 0x367   :  { %1043 = vadd.xlane.f32.xlu0 %v2558_v22 }
 0x36a   :  { %v2561_v50 = vpop.eup %1845 }
 0x36b   :  { %1053 = vadd.xlane.f32.xlu1 %v2561_v50 }
 0x36e   :  { %v2564_v13 = vpop.eup %1847 }
 0x36f   :  { %1049 = vadd.xlane.f32.xlu0 %v2564_v13  ;;  %v2567_v57 = vpop.eup %1849 }
 0x370   :  { %v2570_v54 = vpop.eup %1851 }
 0x373   :  { %1055 = vadd.xlane.f32.xlu0 %v2567_v57 }
 0x377   :  { %1051 = vadd.xlane.f32.xlu0 %v2570_v54 }
 0x37c   :  { %1151 = vrot.lane.b32.xlu1 %v2077_v46, %s1945_s26 }
 0x38d   :  { %1272 = vrot.lane.b32.xlu0 %v2115_v48, %s1945_s26  ;;  %v1000_v56 = vpop.xlane.xlu0 %999 }
 0x38e   :  { %1853 = vrcp.f32 %v1000_v56 }
 0x391   :  { %v996_v38 = vpop.xlane.xlu0 %995 }
 0x394   :  { %v998_v17 = vpop.xlane.xlu1 %997 }
 0x395   :  { %1855 = vrcp.f32 %v998_v17 }
 0x396   :  { %1857 = vrcp.f32 %v996_v38 }
 0x398   :  { %v994_v30 = vpop.xlane.xlu1 %993  ;;  %v1854_v0 = vpop.eup %1853 }
 0x399   :  { %1859 = vrcp.f32 %v994_v30  ;;  %v2578_v63 = vmul.f32 %v1854_v0, %v2450_v7 }
 0x39c   :  { %v1002_v59 = vpop.xlane.xlu0 %1001  ;;  %v1006_v19 = vpop.xlane.xlu1 %1005 }
 0x39d   :  { %1861 = vrcp.f32 %v1006_v19 }
 0x39f   :  { %v1856_v23 = vpop.eup %1855 }
 0x3a0   :  { %v2581_v46 = vmul.f32 %v1856_v23, %v2459_v20  ;;  %v1008_v48 = vpop.xlane.xlu0 %1007  ;;  %v1858_v5 = vpop.eup %1857 }
 0x3a1   :  { %1863 = vrcp.f32 %v1008_v48  ;;  %v1090_v3 = vmul.f32 %v1858_v5, %v2456_v16  ;;  %v1004_v28 = vpop.xlane.xlu1 %1003 }
 0x3a2   :  { %v1122_v24 = vpack.c.bf16 %v2578_v63, %v2581_v46 }
 0x3a3   :  { %v1860_v32 = vpop.eup %1859 }
 0x3a4   :  { %v1089_v33 = vmul.f32 %v1860_v32, %v2462_v45 }
 0x3a6   :  { %v1121_v27 = vpack.c.bf16 %v1090_v3, %v1089_v33 }
 0x3a7   :  { %v1862_v7 = vpop.eup %1861 }
 0x3a8   :  { %1704 = vmatprep.mubr.bf16.mxu0 %v1121_v27  ;;  %v1014_v36 = vpop.xlane.xlu1 %1013  ;;  %v2588_v34 = vmul.f32 %v1862_v7, %v2466_v25 }
 0x3a9   :  { %1865 = vrcp.f32 %v1014_v36 }
 0x3ab   :  { %v1864_v4 = vpop.eup %1863 }
 0x3ac   :  { %v1010_v20 = vpop.xlane.xlu0 %1009  ;;  %v2591_v18 = vmul.f32 %v1864_v4, %v2474_v51 }
 0x3ae   :  { %v1124_v8 = vpack.c.bf16 %v2591_v18, %v2588_v34  ;;  %v1012_v16 = vpop.xlane.xlu1 %1011 }
 0x3b0   :  { %v1016_v45 = vpop.xlane.xlu0 %1015 }
 0x3b1   :  { %1867 = vrcp.f32 %v1016_v45 }
 0x3b3   :  { %v1866_v10 = vpop.eup %1865 }
 0x3b4   :  { %v2596_v12 = vmul.f32 %v1866_v10, %v2481_v55 }
 0x3b8   :  { %v1022_v26 = vpop.xlane.xlu1 %1021 }
 0x3b9   :  { %1869 = vrcp.f32 %v1022_v26 }
 0x3bb   :  { %v1868_v37 = vpop.eup %1867 }
 0x3bc   :  { %v1018_v35 = vpop.xlane.xlu0 %1017  ;;  %v2599_v25 = vmul.f32 %v1868_v37, %v2493_v1 }
 0x3be   :  { %v1126_v51 = vpack.c.bf16 %v2599_v25, %v2596_v12  ;;  %v1020_v43 = vpop.xlane.xlu1 %1019 }
 0x3c0   :  { %v1024_v44 = vpop.xlane.xlu0 %1023 }
 0x3c1   :  { %1871 = vrcp.f32 %v1024_v44 }
 0x3c3   :  { %v1870_v52 = vpop.eup %1869 }
 0x3c4   :  { %v2604_v38 = vmul.f32 %v1870_v52, %v2497_v9 }
 0x3c8   :  { %v1030_v6 = vpop.xlane.xlu1 %1029 }
 0x3cb   :  { %v1872_v56 = vpop.eup %1871 }
 0x3cc   :  { %v2607_v17 = vmul.f32 %v1872_v56, %v2509_v49  ;;  %v1026_v55 = vpop.xlane.xlu1 %1025 }
 0x3cd   :  { %v1032_v30 = vpop.xlane.xlu0 %1031  ;;  %1873 = vrcp.f32 %v1026_v55 }
 0x3ce   :  { %v1128_v1 = vpack.c.bf16 %v2607_v17, %v2604_v38 }
 0x3d1   :  { %v1028_v0 = vpop.xlane.xlu0 %1027 }
 0x3d2   :  { %1875 = vrcp.f32 %v1028_v0 }
 0x3d3   :  { %1877 = vrcp.f32 %v1004_v28 }
 0x3d4   :  { %1879 = vrcp.f32 %v1002_v59 }
 0x3d5   :  { %1881 = vrcp.f32 %v1012_v16 }
 0x3d6   :  { %1883 = vrcp.f32 %v1010_v20 }
 0x3d7   :  { %v1874_v19 = vpop.eup %1873  ;;  %1885 = vrcp.f32 %v1032_v30 }
 0x3d8   :  { %v1105_v5 = vmul.f32 %v1874_v19, %v2517_v62  ;;  %v1038_v27 = vpop.xlane.xlu1 %1037 }
 0x3dc   :  { %v1876_v23 = vpop.eup %1875  ;;  %v1034_v48 = vpop.xlane.xlu0 %1033 }
 0x3dd   :  { %v1106_v32 = vmul.f32 %v1876_v23, %v2525_v58  ;;  %v1878_v10 = vpop.eup %1877 }
 0x3de   :  { %v1880_v62 = vpop.eup %1879  ;;  %v1094_v26 = vmul.f32 %v1878_v10, %v2476_v53 }
 0x3df   :  { %v1129_v9 = vpack.c.bf16 %v1106_v32, %v1105_v5  ;;  %v1093_v59 = vmul.f32 %v1880_v62, %v2468_v31  ;;  %v1882_v44 = vpop.eup %1881 }
 0x3e0   :  { %v1040_v33 = vpop.xlane.xlu0 %1039  ;;  %v1884_v20 = vpop.eup %1883  ;;  %v1098_v52 = vmul.f32 %v1882_v44, %v2488_v60 }
 0x3e1   :  { %1736 = vmatprep.mubr.bf16.mxu1 %v1129_v9  ;;  %v1123_v16 = vpack.c.bf16 %v1094_v26, %v1093_v59 }
 0x3e4   :  { %v1036_v49 = vpop.xlane.xlu0 %1035 }
 0x3e5   :  { %1887 = vrcp.f32 %v1036_v49 }
 0x3e6   :  { %1889 = vrcp.f32 %v1030_v6  ;;  %v1886_v6 = vpop.eup %1885 }
 0x3e7   :  { %1891 = vrcp.f32 %v1034_v48 }
 0x3e8   :  { %v1046_v4 = vpop.xlane.xlu1 %1045  ;;  %1893 = vrcp.f32 %v1020_v43  ;;  %v1097_v43 = vmul.f32 %v1884_v20, %v2485_v21 }
 0x3e9   :  { %1895 = vrcp.f32 %v1018_v35  ;;  %v1108_v35 = vmul.f32 %v1886_v6, %v2519_v14 }
 0x3ea   :  { %1897 = vrcp.f32 %v1040_v33  ;;  %v1125_v63 = vpack.c.bf16 %v1098_v52, %v1097_v43 }
 0x3ec   :  { %v1042_v3 = vpop.xlane.xlu0 %1041 }
 0x3ef   :  { %v1888_v56 = vpop.eup %1887 }
 0x3f0   :  { %v1048_v7 = vpop.xlane.xlu0 %1047  ;;  %v1890_v31 = vpop.eup %1889  ;;  %v1110_v46 = vmul.f32 %v1888_v56, %v2542_v11 }
 0x3f1   :  { %v1892_v55 = vpop.eup %1891  ;;  %v1107_v0 = vmul.f32 %v1890_v31, %v2513_v40 }
 0x3f2   :  { %v1109_v21 = vmul.f32 %v1892_v55, %v2533_v39 }
 0x3f3   :  { %v1130_v14 = vpack.c.bf16 %v1108_v35, %v1107_v0 }
 0x3f4   :  { %v1044_v36 = vpop.xlane.xlu0 %1043  ;;  %v1131_v23 = vpack.c.bf16 %v1110_v46, %v1109_v21 }
 0x3f5   :  { %1899 = vrcp.f32 %v1044_v36 }
 0x3f6   :  { %1901 = vrcp.f32 %v1038_v27 }
 0x3f7   :  { %1903 = vrcp.f32 %v1042_v3 }
 0x3f8   :  { %v2613_v45 = vpop.xlane.xlu1 %1053  ;;  %1905 = vrcp.f32 %v1048_v7 }
 0x3fc   :  { %v1152_v58 = vpop.permute.xlu1 %1151  ;;  %v1050_v37 = vpop.xlane.xlu0 %1049 }
 0x3fd   :  { %1702 = vmatprep.subr.bf16.mxu0 %v1152_v58 }
 0x3fe   :  { %1703 = vmatpush3.bf16.msra.mxu0 %v1152_v58 }
 0x400   :  { %v1056_v28 = vpop.xlane.xlu0 %1055 }
 0x401   :  { %1705 = vmatmul.mubr.bf16.vlgmr.msra.gmra.mrb[64].mxu0 %v1122_v24  ;;  %v1894_v24 = vpop.eup %1893 }
 0x402   :  { %1708 = vmatprep.mubr.bf16.mxu0 %v1123_v16  ;;  %v1896_v60 = vpop.eup %1895  ;;  %v1102_v11 = vmul.f32 %v1894_v24, %v2505_v15 }
 0x403   :  { %v1898_v19 = vpop.eup %1897  ;;  %v1101_v34 = vmul.f32 %v1896_v60, %v2502_v29 }
 0x404   :  { %v1052_v53 = vpop.xlane.xlu0 %1051  ;;  %v1900_v48 = vpop.eup %1899 }
 0x405   :  { %1907 = vrcp.f32 %v1052_v53  ;;  %v1902_v40 = vpop.eup %1901  ;;  %v1127_v5 = vpack.c.bf16 %v1102_v11, %v1101_v34  ;;  %v1114_v39 = vmul.f32 %v1900_v48, %v2558_v22 }
 0x406   :  { %1909 = vrcp.f32 %v1046_v4  ;;  %v1904_v18 = vpop.eup %1903  ;;  %v1111_v32 = vmul.f32 %v1902_v40, %v2529_v61 }
 0x407   :  { %1911 = vrcp.f32 %v1050_v37  ;;  %v1113_v15 = vmul.f32 %v1904_v18, %v2549_v47  ;;  %v1906_v33 = vpop.eup %1905 }
 0x408   :  { %v1273_v30 = vpop.permute.xlu0 %1272  ;;  %1913 = vrcp.f32 %v1056_v28  ;;  %v1116_v3 = vmul.f32 %v1906_v33, %v2554_v41 }
 0x409   :  { %1709 = vmatmul.mubr.bf16.gmra.mrb[68].mxu0 %v1124_v8  ;;  %1734 = vmatprep.subr.bf16.mxu1 %v1273_v30  ;;  %v1112_v8 = vmul.f32 %v1898_v19, %v2538_v2  ;;  %1915 = vrcp.f32 %v2613_v45  ;;  %v1133_v29 = vpack.c.bf16 %v1114_v39, %v1113_v15 }
 0x40a   :  { %1712 = vmatprep.mubr.bf16.mxu0 %v1125_v63  ;;  %1735 = vmatpush3.bf16.msra.mxu1 %v1273_v30 }
 0x40b   :  { %v1132_v9 = vpack.c.bf16 %v1112_v8, %v1111_v32 }
 0x40d   :  { %1737 = vmatmul.mubr.bf16.vlgmr.msra.gmra.mrb[32].mxu1 %v1130_v14 }
 0x40e   :  { %1740 = vmatprep.mubr.bf16.mxu1 %v1131_v23 }
 0x40f   :  { %v1908_v49 = vpop.eup %1907 }
 0x410   :  { %v1910_v2 = vpop.eup %1909  ;;  %v1118_v12 = vmul.f32 %v1908_v49, %v2570_v54 }
 0x411   :  { %1713 = vmatmul.mubr.bf16.gmra.mrb[72].mxu0 %v1126_v51  ;;  %v1912_v22 = vpop.eup %1911  ;;  %v1115_v61 = vmul.f32 %v1910_v2, %v2545_v42 }
 0x412   :  { %1716 = vmatprep.mubr.bf16.mxu0 %v1127_v5  ;;  %v1117_v47 = vmul.f32 %v1912_v22, %v2564_v13  ;;  %v1914_v51 = vpop.eup %1913 }
 0x413   :  { %v1134_v25 = vpack.c.bf16 %v1116_v3, %v1115_v61  ;;  %v1916_v7 = vpop.eup %1915  ;;  %v1120_v4 = vmul.f32 %v1914_v51, %v2567_v57 }
 0x414   :  { %v1135_v27 = vpack.c.bf16 %v1118_v12, %v1117_v47  ;;  %v1119_v41 = vmul.f32 %v1916_v7, %v2561_v50 }
 0x415   :  { %1741 = vmatmul.mubr.bf16.gmra.mrb[36].mxu1 %v1132_v9 }
 0x416   :  { %1744 = vmatprep.mubr.bf16.mxu1 %v1133_v29  ;;  %v1136_v36 = vpack.c.bf16 %v1120_v4, %v1119_v41 }
 0x419   :  { %1717 = vmatmul.mubr.bf16.gmra.mrb[76].mxu0 %v1128_v1 }
 0x41d   :  { %1745 = vmatmul.mubr.bf16.gmra.mrb[40].mxu1 %v1134_v25 }
 0x41e   :  { %1748 = vmatprep.mubr.bf16.mxu1 %v1135_v27 }
 0x425   :  { %1749 = vmatmul.mubr.bf16.gmra.mrb[44].mxu1 %v1136_v36 }
 0x4d4   :  { %v1706_v54 = vpop.f32.mrb[64].mxu0 }
 0x4d5   :  { %1381 = vst.msk [vmem:[%s2778_s2 + $0x10] sm:$0xff] %vm2780_vm0, %v1706_v54  ;;  %v1195_v42 = vpop.f32.mrb[65].mxu0 }
 0x4d6   :  { %1379 = vst.msk [vmem:[%s2778_s2] sm:$0xff] %vm2781_vm1, %v1195_v42  ;;  %v1707_v13 = vpop.f32.mrb[66].mxu0  ;;  %vm2796_vm1 = vmmov %vm2780_vm0 }
 0x4d7   :  { %1382 = vst.msk [vmem:[%s2778_s2 + $0x18] sm:$0xff] %vm2782_vm2, %v1707_v13  ;;  %v1198_v50 = vpop.f32.mrb[67].mxu0  ;;  %vm2797_vm2 = vmmov %vm2780_vm0 }
 0x4d8   :  { %1380 = vst.msk [vmem:[%s2778_s2 + $0x8] sm:$0xff] %vm2783_vm3, %v1198_v50  ;;  %vm2798_vm3 = vmmov %vm2780_vm0 }
 0x4dc   :  { %v1710_v57 = vpop.f32.mrb[68].mxu0 }
 0x4dd   :  { %1385 = vst.msk [vmem:[%s2778_s2 + $0x30] sm:$0xff] %vm2784_vm4, %v1710_v57  ;;  %v1211_v38 = vpop.f32.mrb[69].mxu0  ;;  %vm2799_vm4 = vmmov %vm2780_vm0 }
 0x4de   :  { %1383 = vst.msk [vmem:[%s2778_s2 + $0x20] sm:$0xff] %vm2785_vm5, %v1211_v38  ;;  %v1711_v17 = vpop.f32.mrb[70].mxu0  ;;  %vm2800_vm5 = vmmov %vm2780_vm0 }
 0x4df   :  { %1386 = vst.msk [vmem:[%s2778_s2 + $0x38] sm:$0xff] %vm2786_vm6, %v1711_v17  ;;  %v1214_v1 = vpop.f32.mrb[71].mxu0  ;;  %vm2801_vm6 = vmmov %vm2780_vm0 }
 0x4e0   :  { %1384 = vst.msk [vmem:[%s2778_s2 + $0x28] sm:$0xff] %vm2787_vm7, %v1214_v1  ;;  %v1738_v45 = vpop.f32.mrb[32].mxu1  ;;  %vm2802_vm7 = vmmov %vm2780_vm0 }
 0x4e1   :  { %1397 = vst.msk [vmem:[%s2778_s2 + $0x90] sm:$0xff] %vm2788_vm8, %v1738_v45  ;;  %v1316_v10 = vpop.f32.mrb[33].mxu1  ;;  %vm2803_vm8 = vmmov %vm2780_vm0 }
 0x4e2   :  { %1395 = vst.msk [vmem:[%s2778_s2 + $0x80] sm:$0xff] %vm2789_vm9, %v1316_v10  ;;  %v1739_v62 = vpop.f32.mrb[34].mxu1  ;;  %vm2804_vm9 = vmmov %vm2780_vm0 }
 0x4e3   :  { %1398 = vst.msk [vmem:[%s2778_s2 + $0x98] sm:$0xff] %vm2790_vm10, %v1739_v62  ;;  %v1319_v58 = vpop.f32.mrb[35].mxu1  ;;  %vm2805_vm10 = vmmov %vm2780_vm0 }
 0x4e4   :  { %1396 = vst.msk [vmem:[%s2778_s2 + $0x88] sm:$0xff] %vm2791_vm11, %v1319_v58  ;;  %v1714_v37 = vpop.f32.mrb[72].mxu0  ;;  %vm2806_vm11 = vmmov %vm2780_vm0 }
 0x4e5   :  { %1389 = vst.msk [vmem:[%s2778_s2 + $0x50] sm:$0xff] %vm2792_vm12, %v1714_v37  ;;  %v1227_v26 = vpop.f32.mrb[73].mxu0  ;;  %vm2807_vm12 = vmmov %vm2780_vm0 }
 0x4e6   :  { %1387 = vst.msk [vmem:[%s2778_s2 + $0x40] sm:$0xff] %vm2793_vm13, %v1227_v26  ;;  %v1715_v59 = vpop.f32.mrb[74].mxu0  ;;  %vm2808_vm13 = vmmov %vm2780_vm0 }
 0x4e7   :  { %1390 = vst.msk [vmem:[%s2778_s2 + $0x58] sm:$0xff] %vm2794_vm14, %v1715_v59  ;;  %v1230_v28 = vpop.f32.mrb[75].mxu0  ;;  %vm2809_vm14 = vmmov %vm2780_vm0 }
 0x4e8   :  { %1388 = vst.msk [vmem:[%s2778_s2 + $0x48] sm:$0xff] %vm2795_vm15, %v1230_v28  ;;  %v1742_v16 = vpop.f32.mrb[36].mxu1  ;;  %vm2810_vm15 = vmmov %vm2780_vm0 }
 0x4e9   :  { %1401 = vst.msk [vmem:[%s2778_s2 + $0xb0] sm:$0xff] %vm2780_vm0, %v1742_v16  ;;  %v1332_v44 = vpop.f32.mrb[37].mxu1 }
 0x4ea   :  { %1399 = vst.msk [vmem:[%s2778_s2 + $0xa0] sm:$0xff] %vm2796_vm1, %v1332_v44  ;;  %v1743_v20 = vpop.f32.mrb[38].mxu1 }
 0x4eb   :  { %1402 = vst.msk [vmem:[%s2778_s2 + $0xb8] sm:$0xff] %vm2797_vm2, %v1743_v20  ;;  %v1335_v6 = vpop.f32.mrb[39].mxu1 }
 0x4ec   :  { %1400 = vst.msk [vmem:[%s2778_s2 + $0xa8] sm:$0xff] %vm2798_vm3, %v1335_v6  ;;  %v1718_v53 = vpop.f32.mrb[76].mxu0 }
 0x4ed   :  { %1393 = vst.msk [vmem:[%s2778_s2 + $0x70] sm:$0xff] %vm2799_vm4, %v1718_v53  ;;  %v1243_v52 = vpop.f32.mrb[77].mxu0 }
 0x4ee   :  { %1391 = vst.msk [vmem:[%s2778_s2 + $0x60] sm:$0xff] %vm2800_vm5, %v1243_v52  ;;  %v1719_v56 = vpop.f32.mrb[78].mxu0 }
 0x4ef   :  { %1394 = vst.msk [vmem:[%s2778_s2 + $0x78] sm:$0xff] %vm2801_vm6, %v1719_v56  ;;  %v1246_v31 = vpop.f32.mrb[79].mxu0 }
 0x4f0   :  { %1392 = vst.msk [vmem:[%s2778_s2 + $0x68] sm:$0xff] %vm2802_vm7, %v1246_v31  ;;  %v1746_v43 = vpop.f32.mrb[40].mxu1 }
 0x4f1   :  { %1405 = vst.msk [vmem:[%s2778_s2 + $0xd0] sm:$0xff] %vm2803_vm8, %v1746_v43  ;;  %v1348_v55 = vpop.f32.mrb[41].mxu1 }
 0x4f2   :  { %1403 = vst.msk [vmem:[%s2778_s2 + $0xc0] sm:$0xff] %vm2804_vm9, %v1348_v55  ;;  %v1747_v35 = vpop.f32.mrb[42].mxu1 }
 0x4f3   :  { %1406 = vst.msk [vmem:[%s2778_s2 + $0xd8] sm:$0xff] %vm2805_vm10, %v1747_v35  ;;  %v1351_v30 = vpop.f32.mrb[43].mxu1 }
 0x4f4   :  { %1404 = vst.msk [vmem:[%s2778_s2 + $0xc8] sm:$0xff] %vm2806_vm11, %v1351_v30 }
 0x4f8   :  { %v1750_v63 = vpop.f32.mrb[44].mxu1 }
 0x4f9   :  { %1409 = vst.msk [vmem:[%s2778_s2 + $0xf0] sm:$0xff] %vm2807_vm12, %v1750_v63  ;;  %v1364_v46 = vpop.f32.mrb[45].mxu1 }
 0x4fa   :  { %1407 = vst.msk [vmem:[%s2778_s2 + $0xe0] sm:$0xff] %vm2808_vm13, %v1364_v46  ;;  %v1751_v24 = vpop.f32.mrb[46].mxu1 }
 0x4fb   :  { %1410 = vst.msk [vmem:[%s2778_s2 + $0xf8] sm:$0xff] %vm2809_vm14, %v1751_v24  ;;  %v1367_v0 = vpop.f32.mrb[47].mxu1 }
 0x4fc   :  { %1408 = vst.msk [vmem:[%s2778_s2 + $0xe8] sm:$0xff] %vm2810_vm15, %v1367_v0 }
 0x4fd   :  { %1415 = vsyncpa [#allocation3], 1 }

</bundles_post_ra>
